<compile_context>
chip_gen: v7x
topology: tpu7x:2x2x1
jax: 0.10.0
libtpu: 0.0.40
codegen_flags: <defaults>
</compile_context>

<pallas_src>
import jax
import jax.numpy as jnp
from jax.experimental import pallas as pl
from jax.experimental.pallas import tpu as pltpu

# ----- small synthetic "MiniLM-like" config (real model: H=384, L=6, heads=12) -----
HIDDEN = 128
HEADS = 4
HEAD_DIM = HIDDEN // HEADS
INTER = 256
LAYERS = 2
VOCAB = 100
MAX_POS = 32
SEQ = 8
LN_EPS = 1e-12
SCALE = 1.0 / float(HEAD_DIM) ** 0.5


# ---------------------------- fused Pallas kernel ----------------------------

def _layernorm(h, gb):
    """LayerNorm over the hidden (last) axis; gb is a (2, H) [gamma; beta] value."""
    g = gb[0:1, :]
    b = gb[1:2, :]
    mean = jnp.mean(h, axis=-1, keepdims=True)
    var = jnp.mean(jnp.square(h - mean), axis=-1, keepdims=True)
    return (h - mean) * jax.lax.rsqrt(var + LN_EPS) * g + b


def _model_kernel(emb_ref, mask_ref, emb_ln_ref,
                  wqkv_ref, bqkv_ref, wo_ref, bo_ref, ln1_ref,
                  w1_ref, b1_ref, w2_ref, b2_ref, ln2_ref,
                  head_w_ref, head_b_ref,
                  out_ref):
    """Whole forward pass in one invocation: embedding LN, LAYERS encoder
    layers (fused QKV, MHA with batched softmax, fused Wo, add&LN, FFN+GELU,
    add&LN), then CLS Linear(H,1)+Sigmoid as a VPU reduce."""
    S = emb_ref.shape[0]
    H = HIDDEN

    # embedding LayerNorm (pure LN, f32)
    x = _layernorm(emb_ref[...], emb_ln_ref[...])          # (S, H) f32
    mask = mask_ref[...]                                    # (1, S) additive key mask

    # NOTE: at real MiniLM size, replace this unrolled loop with grid=(LAYERS,)
    # and per-layer weight BlockSpecs so weight DMA is double-buffered.
    for l in range(LAYERS):
        # ---- fused QKV projection: one lane-dense (S,H)@(H,3H) matmul ----
        qkv = jnp.dot(x.astype(jnp.bfloat16), wqkv_ref[l],
                      preferred_element_type=jnp.float32) + bqkv_ref[l]   # (S, 3H) f32

        # ---- per-head scores stacked along sublanes -> one (HEADS*S, S) slab ----
        s_parts = []
        for h in range(HEADS):
            qh = qkv[:, h * HEAD_DIM:(h + 1) * HEAD_DIM]                  # (S, Dh)
            kh = qkv[:, H + h * HEAD_DIM:H + (h + 1) * HEAD_DIM]          # (S, Dh)
            s_parts.append(jax.lax.dot_general(
                qh, kh, (((1,), (1,)), ((), ())),
                preferred_element_type=jnp.float32))                      # (S, S)
        # single mask broadcast + single max/exp/sum/reciprocal for all heads
        s_all = jnp.concatenate(s_parts, axis=0) * SCALE + mask           # (HEADS*S, S)
        s_all = s_all - jnp.max(s_all, axis=-1, keepdims=True)
        p_all = jnp.exp(s_all)
        inv = pl.reciprocal(jnp.sum(p_all, axis=-1, keepdims=True), approx=True)
        p_all = p_all * inv                                               # (HEADS*S, S)

        # ---- per-head context, lane-concatenated into one (S, H) slab ----
        ctx_parts = []
        for h in range(HEADS):
            p_h = p_all[h * S:(h + 1) * S, :].astype(jnp.bfloat16)        # (S, S)
            v_h = qkv[:, 2 * H + h * HEAD_DIM:
                      2 * H + (h + 1) * HEAD_DIM].astype(jnp.bfloat16)    # (S, Dh)
            ctx_parts.append(jnp.dot(p_h, v_h,
                                     preferred_element_type=jnp.float32)) # (S, Dh)
        ctx = jnp.concatenate(ctx_parts, axis=-1)                         # (S, H)

        # ---- fused output projection: one K=128 matmul ----
        attn = jnp.dot(ctx.astype(jnp.bfloat16), wo_ref[l],
                       preferred_element_type=jnp.float32) + bo_ref[l]    # (S, H)

        x = _layernorm(x + attn, ln1_ref[l])

        # ---- feed-forward (bias + GELU fused in-kernel) ----
        ff = jnp.dot(x.astype(jnp.bfloat16), w1_ref[l],
                     preferred_element_type=jnp.float32) + b1_ref[l]      # (S, I)
        # TODO(synk): HF BERT "gelu" is erf-based; tanh-approx used for Mosaic portability.
        ff = jax.nn.gelu(ff, approximate=True)
        ff = jnp.dot(ff.astype(jnp.bfloat16), w2_ref[l],
                     preferred_element_type=jnp.float32) + b2_ref[l]      # (S, H)

        x = _layernorm(x + ff, ln2_ref[l])

    # ---- CLS token -> Linear(H,1)+Sigmoid as a VPU dot-product reduce ----
    logit = jnp.sum(x[0:1, :] * head_w_ref[...], axis=-1, keepdims=True)  # (1, 1)
    out_ref[...] = jax.nn.sigmoid(logit + head_b_ref[...])


# ----------------------- parameters (deterministic, synthetic) -----------------------

def init_params(key):
    keys = jax.random.split(key, 5)
    lk = jax.random.split(keys[4], 4)

    def w(k, shape, dtype):
        return (0.02 * jax.random.normal(k, shape)).astype(dtype)

    def ln_stack(n):
        return jnp.stack([jnp.ones((n, HIDDEN)), jnp.zeros((n, HIDDEN))],
                         axis=1).astype(jnp.float32)          # (n, 2, H)

    return {
        "word_emb": w(keys[0], (VOCAB, HIDDEN), jnp.float32),
        "pos_emb": w(keys[1], (MAX_POS, HIDDEN), jnp.float32),
        "type_emb": w(keys[2], (2, HIDDEN), jnp.float32),
        "emb_ln": jnp.stack([jnp.ones((HIDDEN,)), jnp.zeros((HIDDEN,))]).astype(jnp.float32),
        # fused QKV, lane-dense: columns [0:H]=Q, [H:2H]=K, [2H:3H]=V, each
        # head h occupying the h*Dh:(h+1)*Dh sub-slice.  bf16 MXU inputs.
        "wqkv": w(lk[0], (LAYERS, HIDDEN, 3 * HIDDEN), jnp.bfloat16),
        "bqkv": jnp.zeros((LAYERS, 1, 3 * HIDDEN), jnp.float32),
        # fused output projection: rows are the lane-concatenated head contexts.
        "wo":   w(lk[1], (LAYERS, HIDDEN, HIDDEN), jnp.bfloat16),
        "bo":   jnp.zeros((LAYERS, 1, HIDDEN), jnp.float32),
        "ln1":  ln_stack(LAYERS),
        "w1":   w(lk[2], (LAYERS, HIDDEN, INTER), jnp.bfloat16),
        "b1":   jnp.zeros((LAYERS, 1, INTER), jnp.float32),
        "w2":   w(lk[3], (LAYERS, INTER, HIDDEN), jnp.bfloat16),
        "b2":   jnp.zeros((LAYERS, 1, HIDDEN), jnp.float32),
        "ln2":  ln_stack(LAYERS),
        # classification head  nn.Linear(hidden, 1) + Sigmoid (kept f32)
        "head_w": w(keys[3], (1, HIDDEN), jnp.float32),
        "head_b": jnp.zeros((1, 1), jnp.float32),
    }


# --------------------------------- forward ---------------------------------

def my_model_forward(params, input_ids, token_type_ids, attention_mask):
    assert input_ids.shape[0] == 1           # matches the PyTorch assert (batch == 1)
    S = input_ids.shape[1]

    # Embedding gather kept as (tiny) JAX glue; everything else is one Pallas call.
    emb = (params["word_emb"][input_ids[0]]
           + params["pos_emb"][jnp.arange(S)]
           + params["type_emb"][token_type_ids[0]])                     # (S, H) f32
    add_mask = (1.0 - attention_mask.astype(jnp.float32)) * -10000.0    # (1, S)

    args = (emb, add_mask, params["emb_ln"],
            params["wqkv"], params["bqkv"], params["wo"], params["bo"], params["ln1"],
            params["w1"], params["b1"], params["w2"], params["b2"], params["ln2"],
            params["head_w"], params["head_b"])

    def full_spec(a):
        nd = a.ndim
        return pl.BlockSpec(a.shape, lambda i, _nd=nd: (0,) * _nd)

    # VMEM budget from the actual operand footprint (double-buffer headroom +
    # margin for intermediates) instead of a blanket 32 MiB — v7x only has
    # 64 MiB physical VMEM.
    operand_bytes = sum(int(a.size) * a.dtype.itemsize for a in args)
    vmem_limit = int(min(100 * 1024 * 1024, 2 * operand_bytes + (8 << 20)))

    return pl.pallas_call(
        _model_kernel,
        out_shape=jax.ShapeDtypeStruct((1, 1), jnp.float32),
        grid_spec=pltpu.PrefetchScalarGridSpec(
            num_scalar_prefetch=0,
            grid=(1,),                                   # single step: all weights fit in VMEM
            in_specs=[full_spec(a) for a in args],
            out_specs=pl.BlockSpec((1, 1), lambda i: (0, 0)),
        ),
        compiler_params=pltpu.CompilerParams(
            # batch is fixed at 1 (PyTorch assert); if batched inference is ever
            # added, put batch on a leading "parallel" grid axis (2 TCs on v7x).
            dimension_semantics=("arbitrary",),
            vmem_limit_bytes=vmem_limit,
        ),
    )(*args)


if __name__ == "__main__":
    key = jax.random.PRNGKey(0)
    pkey, ikey = jax.random.split(key)
    params = init_params(pkey)

    input_ids = jax.random.randint(ikey, (1, SEQ), 0, VOCAB, dtype=jnp.int32)
    token_type_ids = jnp.zeros((1, SEQ), jnp.int32)
    attention_mask = jnp.concatenate(
        [jnp.ones((1, SEQ - 2), jnp.int32), jnp.zeros((1, 2), jnp.int32)], axis=1)

    forward = jax.jit(my_model_forward)
    out = forward(params, input_ids, token_type_ids, attention_mask)
    jax.block_until_ready(out)
    assert out.shape == (1, 1) and out.dtype == jnp.float32
    assert bool(jnp.all((out > 0.0) & (out < 1.0)))
    print("KERNEL_OK")
</pallas_src>

<mosaic_0001>
module attributes {stable_mosaic.version = 11 : i64} {
  func.func @_model_kernel(%arg0: i32, %arg1: memref<8x128xf32, #tpu.memory_space<vmem>>, %arg2: memref<1x8xf32, #tpu.memory_space<vmem>>, %arg3: memref<2x128xf32, #tpu.memory_space<vmem>>, %arg4: memref<2x128x384xbf16, #tpu.memory_space<vmem>>, %arg5: memref<2x1x384xf32, #tpu.memory_space<vmem>>, %arg6: memref<2x128x128xbf16, #tpu.memory_space<vmem>>, %arg7: memref<2x1x128xf32, #tpu.memory_space<vmem>>, %arg8: memref<2x2x128xf32, #tpu.memory_space<vmem>>, %arg9: memref<2x128x256xbf16, #tpu.memory_space<vmem>>, %arg10: memref<2x1x256xf32, #tpu.memory_space<vmem>>, %arg11: memref<2x256x128xbf16, #tpu.memory_space<vmem>>, %arg12: memref<2x1x128xf32, #tpu.memory_space<vmem>>, %arg13: memref<2x2x128xf32, #tpu.memory_space<vmem>>, %arg14: memref<1x128xf32, #tpu.memory_space<vmem>>, %arg15: memref<1x1xf32, #tpu.memory_space<vmem>>, %arg16: memref<1x1xf32, #tpu.memory_space<vmem>>) attributes {dimension_semantics = [#tpu.dimension_semantics<arbitrary>], iteration_bounds = array<i64: 1>, scalar_prefetch = 0 : i64, scratch_operands = 0 : i64, tpu.core_type = #tpu.core_type<tc>, window_params = [{pipeline_mode = #tpu.pipeline_mode<synchronous>, transform_indices = @transform_0, window_bounds = array<i64: 8, 128>}, {pipeline_mode = #tpu.pipeline_mode<synchronous>, transform_indices = @transform_1, window_bounds = array<i64: 1, 8>}, {pipeline_mode = #tpu.pipeline_mode<synchronous>, transform_indices = @transform_2, window_bounds = array<i64: 2, 128>}, {pipeline_mode = #tpu.pipeline_mode<synchronous>, transform_indices = @transform_3, window_bounds = array<i64: 2, 128, 384>}, {pipeline_mode = #tpu.pipeline_mode<synchronous>, transform_indices = @transform_4, window_bounds = array<i64: 2, 1, 384>}, {pipeline_mode = #tpu.pipeline_mode<synchronous>, transform_indices = @transform_5, window_bounds = array<i64: 2, 128, 128>}, {pipeline_mode = #tpu.pipeline_mode<synchronous>, transform_indices = @transform_6, window_bounds = array<i64: 2, 1, 128>}, {pipeline_mode = #tpu.pipeline_mode<synchronous>, transform_indices = @transform_7, window_bounds = array<i64: 2, 2, 128>}, {pipeline_mode = #tpu.pipeline_mode<synchronous>, transform_indices = @transform_8, window_bounds = array<i64: 2, 128, 256>}, {pipeline_mode = #tpu.pipeline_mode<synchronous>, transform_indices = @transform_9, window_bounds = array<i64: 2, 1, 256>}, {pipeline_mode = #tpu.pipeline_mode<synchronous>, transform_indices = @transform_10, window_bounds = array<i64: 2, 256, 128>}, {pipeline_mode = #tpu.pipeline_mode<synchronous>, transform_indices = @transform_11, window_bounds = array<i64: 2, 1, 128>}, {pipeline_mode = #tpu.pipeline_mode<synchronous>, transform_indices = @transform_12, window_bounds = array<i64: 2, 2, 128>}, {pipeline_mode = #tpu.pipeline_mode<synchronous>, transform_indices = @transform_13, window_bounds = array<i64: 1, 128>}, {pipeline_mode = #tpu.pipeline_mode<synchronous>, transform_indices = @transform_14, window_bounds = array<i64: 1, 1>}, {pipeline_mode = #tpu.pipeline_mode<synchronous>, transform_indices = @transform_15, window_bounds = array<i64: 1, 1>}]} {
    %c0 = arith.constant 0 : index
    %c0_0 = arith.constant 0 : index
    %0 = vector.load %arg1[%c0, %c0_0] : memref<8x128xf32, #tpu.memory_space<vmem>>, vector<8x128xf32>
    %c0_1 = arith.constant 0 : index
    %c0_2 = arith.constant 0 : index
    %1 = vector.load %arg3[%c0_1, %c0_2] : memref<2x128xf32, #tpu.memory_space<vmem>>, vector<2x128xf32>
    %2 = vector.extract_strided_slice %1 {offsets = [0, 0], sizes = [1, 128], strides = [1, 1]} : vector<2x128xf32> to vector<1x128xf32>
    %3 = vector.extract_strided_slice %1 {offsets = [1, 0], sizes = [1, 128], strides = [1, 1]} : vector<2x128xf32> to vector<1x128xf32>
    %cst = arith.constant dense<0.000000e+00> : vector<8xf32>
    %4 = vector.multi_reduction <add>, %0, %cst [1] : vector<8x128xf32> to vector<8xf32>
    %5 = vector.shape_cast %4 : vector<8xf32> to vector<8x1xf32>
    %cst_3 = arith.constant 1.280000e+02 : f32
    %6 = vector.broadcast %cst_3 : f32 to vector<8x1xf32>
    %7 = arith.divf %5, %6 : vector<8x1xf32>
    %8 = vector.broadcast %7 : vector<8x1xf32> to vector<8x128xf32>
    %9 = arith.subf %0, %8 : vector<8x128xf32>
    %10 = arith.mulf %9, %9 : vector<8x128xf32>
    %cst_4 = arith.constant dense<0.000000e+00> : vector<8xf32>
    %11 = vector.multi_reduction <add>, %10, %cst_4 [1] : vector<8x128xf32> to vector<8xf32>
    %12 = vector.shape_cast %11 : vector<8xf32> to vector<8x1xf32>
    %cst_5 = arith.constant 1.280000e+02 : f32
    %13 = vector.broadcast %cst_5 : f32 to vector<8x1xf32>
    %14 = arith.divf %12, %13 : vector<8x1xf32>
    %15 = vector.broadcast %7 : vector<8x1xf32> to vector<8x128xf32>
    %16 = arith.subf %0, %15 : vector<8x128xf32>
    %cst_6 = arith.constant 9.99999996E-13 : f32
    %17 = vector.broadcast %cst_6 : f32 to vector<8x1xf32>
    %18 = arith.addf %14, %17 : vector<8x1xf32>
    %19 = math.rsqrt %18 : vector<8x1xf32>
    %20 = vector.broadcast %19 : vector<8x1xf32> to vector<8x128xf32>
    %21 = arith.mulf %16, %20 : vector<8x128xf32>
    %22 = vector.broadcast %2 : vector<1x128xf32> to vector<8x128xf32>
    %23 = arith.mulf %21, %22 : vector<8x128xf32>
    %24 = vector.broadcast %3 : vector<1x128xf32> to vector<8x128xf32>
    %25 = arith.addf %23, %24 : vector<8x128xf32>
    %c0_7 = arith.constant 0 : index
    %c0_8 = arith.constant 0 : index
    %26 = vector.load %arg2[%c0_7, %c0_8] : memref<1x8xf32, #tpu.memory_space<vmem>>, vector<1x8xf32>
    %27 = arith.truncf %25 : vector<8x128xf32> to vector<8x128xbf16>
    %c0_9 = arith.constant 0 : index
    %c0_10 = arith.constant 0 : index
    %c0_11 = arith.constant 0 : index
    %28 = vector.load %arg4[%c0_9, %c0_10, %c0_11] : memref<2x128x384xbf16, #tpu.memory_space<vmem>>, vector<1x128x384xbf16>
    %29 = vector.shape_cast %28 : vector<1x128x384xbf16> to vector<128x384xbf16>
    %cst_12 = arith.constant dense<0.000000e+00> : vector<8x384xf32>
    %30 = tpu.matmul %27, %29, %cst_12 {dimension_numbers = #tpu.dot_dimension_numbers<[1], [0], [0], [1], [0, 0, 1, 1], [], []>} : vector<8x128xbf16>, vector<128x384xbf16>, vector<8x384xf32> -> vector<8x384xf32>
    %c0_13 = arith.constant 0 : index
    %c0_14 = arith.constant 0 : index
    %c0_15 = arith.constant 0 : index
    %31 = vector.load %arg5[%c0_13, %c0_14, %c0_15] : memref<2x1x384xf32, #tpu.memory_space<vmem>>, vector<1x1x384xf32>
    %32 = vector.shape_cast %31 : vector<1x1x384xf32> to vector<1x384xf32>
    %33 = vector.broadcast %32 : vector<1x384xf32> to vector<8x384xf32>
    %34 = arith.addf %30, %33 : vector<8x384xf32>
    %35 = vector.extract_strided_slice %34 {offsets = [0, 0], sizes = [8, 32], strides = [1, 1]} : vector<8x384xf32> to vector<8x32xf32>
    %36 = vector.extract_strided_slice %34 {offsets = [0, 128], sizes = [8, 32], strides = [1, 1]} : vector<8x384xf32> to vector<8x32xf32>
    %cst_16 = arith.constant dense<0.000000e+00> : vector<8x8xf32>
    %37 = tpu.matmul %35, %36, %cst_16 {dimension_numbers = #tpu.dot_dimension_numbers<[1], [1], [0], [0], [0, 0, 1, 0], [], []>} : vector<8x32xf32>, vector<8x32xf32>, vector<8x8xf32> -> vector<8x8xf32>
    %38 = vector.extract_strided_slice %34 {offsets = [0, 32], sizes = [8, 32], strides = [1, 1]} : vector<8x384xf32> to vector<8x32xf32>
    %39 = vector.extract_strided_slice %34 {offsets = [0, 160], sizes = [8, 32], strides = [1, 1]} : vector<8x384xf32> to vector<8x32xf32>
    %cst_17 = arith.constant dense<0.000000e+00> : vector<8x8xf32>
    %40 = tpu.matmul %38, %39, %cst_17 {dimension_numbers = #tpu.dot_dimension_numbers<[1], [1], [0], [0], [0, 0, 1, 0], [], []>} : vector<8x32xf32>, vector<8x32xf32>, vector<8x8xf32> -> vector<8x8xf32>
    %41 = vector.extract_strided_slice %34 {offsets = [0, 64], sizes = [8, 32], strides = [1, 1]} : vector<8x384xf32> to vector<8x32xf32>
    %42 = vector.extract_strided_slice %34 {offsets = [0, 192], sizes = [8, 32], strides = [1, 1]} : vector<8x384xf32> to vector<8x32xf32>
    %cst_18 = arith.constant dense<0.000000e+00> : vector<8x8xf32>
    %43 = tpu.matmul %41, %42, %cst_18 {dimension_numbers = #tpu.dot_dimension_numbers<[1], [1], [0], [0], [0, 0, 1, 0], [], []>} : vector<8x32xf32>, vector<8x32xf32>, vector<8x8xf32> -> vector<8x8xf32>
    %44 = vector.extract_strided_slice %34 {offsets = [0, 96], sizes = [8, 32], strides = [1, 1]} : vector<8x384xf32> to vector<8x32xf32>
    %45 = vector.extract_strided_slice %34 {offsets = [0, 224], sizes = [8, 32], strides = [1, 1]} : vector<8x384xf32> to vector<8x32xf32>
    %cst_19 = arith.constant dense<0.000000e+00> : vector<8x8xf32>
    %46 = tpu.matmul %44, %45, %cst_19 {dimension_numbers = #tpu.dot_dimension_numbers<[1], [1], [0], [0], [0, 0, 1, 0], [], []>} : vector<8x32xf32>, vector<8x32xf32>, vector<8x8xf32> -> vector<8x8xf32>
    %47 = tpu.concatenate %37, %40, %43, %46 in 0 : vector<8x8xf32>, vector<8x8xf32>, vector<8x8xf32>, vector<8x8xf32> -> vector<32x8xf32>
    %cst_20 = arith.constant 0.176776692 : f32
    %48 = vector.broadcast %cst_20 : f32 to vector<32x8xf32>
    %49 = arith.mulf %47, %48 : vector<32x8xf32>
    %50 = vector.broadcast %26 : vector<1x8xf32> to vector<32x8xf32>
    %51 = arith.addf %49, %50 : vector<32x8xf32>
    %cst_21 = arith.constant dense<0xFF800000> : vector<32xf32>
    %52 = vector.multi_reduction <maximumf>, %51, %cst_21 [1] : vector<32x8xf32> to vector<32xf32>
    %53 = vector.shape_cast %52 : vector<32xf32> to vector<32x1xf32>
    %54 = vector.broadcast %53 : vector<32x1xf32> to vector<32x8xf32>
    %55 = arith.subf %51, %54 : vector<32x8xf32>
    %56 = math.exp %55 : vector<32x8xf32>
    %cst_22 = arith.constant dense<0.000000e+00> : vector<32xf32>
    %57 = vector.multi_reduction <add>, %56, %cst_22 [1] : vector<32x8xf32> to vector<32xf32>
    %58 = vector.shape_cast %57 : vector<32xf32> to vector<32x1xf32>
    %59 = tpu.reciprocal %58 {approx = true} : vector<32x1xf32> -> vector<32x1xf32>
    %60 = vector.broadcast %59 : vector<32x1xf32> to vector<32x8xf32>
    %61 = arith.mulf %56, %60 : vector<32x8xf32>
    %62 = vector.extract_strided_slice %61 {offsets = [0, 0], sizes = [8, 8], strides = [1, 1]} : vector<32x8xf32> to vector<8x8xf32>
    %63 = arith.truncf %62 : vector<8x8xf32> to vector<8x8xbf16>
    %64 = vector.extract_strided_slice %34 {offsets = [0, 256], sizes = [8, 32], strides = [1, 1]} : vector<8x384xf32> to vector<8x32xf32>
    %65 = arith.truncf %64 : vector<8x32xf32> to vector<8x32xbf16>
    %cst_23 = arith.constant dense<0.000000e+00> : vector<8x32xf32>
    %66 = tpu.matmul %63, %65, %cst_23 {dimension_numbers = #tpu.dot_dimension_numbers<[1], [0], [0], [1], [0, 0, 1, 1], [], []>} : vector<8x8xbf16>, vector<8x32xbf16>, vector<8x32xf32> -> vector<8x32xf32>
    %67 = vector.extract_strided_slice %61 {offsets = [8, 0], sizes = [8, 8], strides = [1, 1]} : vector<32x8xf32> to vector<8x8xf32>
    %68 = arith.truncf %67 : vector<8x8xf32> to vector<8x8xbf16>
    %69 = vector.extract_strided_slice %34 {offsets = [0, 288], sizes = [8, 32], strides = [1, 1]} : vector<8x384xf32> to vector<8x32xf32>
    %70 = arith.truncf %69 : vector<8x32xf32> to vector<8x32xbf16>
    %cst_24 = arith.constant dense<0.000000e+00> : vector<8x32xf32>
    %71 = tpu.matmul %68, %70, %cst_24 {dimension_numbers = #tpu.dot_dimension_numbers<[1], [0], [0], [1], [0, 0, 1, 1], [], []>} : vector<8x8xbf16>, vector<8x32xbf16>, vector<8x32xf32> -> vector<8x32xf32>
    %72 = vector.extract_strided_slice %61 {offsets = [16, 0], sizes = [8, 8], strides = [1, 1]} : vector<32x8xf32> to vector<8x8xf32>
    %73 = arith.truncf %72 : vector<8x8xf32> to vector<8x8xbf16>
    %74 = vector.extract_strided_slice %34 {offsets = [0, 320], sizes = [8, 32], strides = [1, 1]} : vector<8x384xf32> to vector<8x32xf32>
    %75 = arith.truncf %74 : vector<8x32xf32> to vector<8x32xbf16>
    %cst_25 = arith.constant dense<0.000000e+00> : vector<8x32xf32>
    %76 = tpu.matmul %73, %75, %cst_25 {dimension_numbers = #tpu.dot_dimension_numbers<[1], [0], [0], [1], [0, 0, 1, 1], [], []>} : vector<8x8xbf16>, vector<8x32xbf16>, vector<8x32xf32> -> vector<8x32xf32>
    %77 = vector.extract_strided_slice %61 {offsets = [24, 0], sizes = [8, 8], strides = [1, 1]} : vector<32x8xf32> to vector<8x8xf32>
    %78 = arith.truncf %77 : vector<8x8xf32> to vector<8x8xbf16>
    %79 = vector.extract_strided_slice %34 {offsets = [0, 352], sizes = [8, 32], strides = [1, 1]} : vector<8x384xf32> to vector<8x32xf32>
    %80 = arith.truncf %79 : vector<8x32xf32> to vector<8x32xbf16>
    %cst_26 = arith.constant dense<0.000000e+00> : vector<8x32xf32>
    %81 = tpu.matmul %78, %80, %cst_26 {dimension_numbers = #tpu.dot_dimension_numbers<[1], [0], [0], [1], [0, 0, 1, 1], [], []>} : vector<8x8xbf16>, vector<8x32xbf16>, vector<8x32xf32> -> vector<8x32xf32>
    %82 = tpu.concatenate %66, %71, %76, %81 in 1 : vector<8x32xf32>, vector<8x32xf32>, vector<8x32xf32>, vector<8x32xf32> -> vector<8x128xf32>
    %83 = arith.truncf %82 : vector<8x128xf32> to vector<8x128xbf16>
    %c0_27 = arith.constant 0 : index
    %c0_28 = arith.constant 0 : index
    %c0_29 = arith.constant 0 : index
    %84 = vector.load %arg6[%c0_27, %c0_28, %c0_29] : memref<2x128x128xbf16, #tpu.memory_space<vmem>>, vector<1x128x128xbf16>
    %85 = vector.shape_cast %84 : vector<1x128x128xbf16> to vector<128x128xbf16>
    %cst_30 = arith.constant dense<0.000000e+00> : vector<8x128xf32>
    %86 = tpu.matmul %83, %85, %cst_30 {dimension_numbers = #tpu.dot_dimension_numbers<[1], [0], [0], [1], [0, 0, 1, 1], [], []>} : vector<8x128xbf16>, vector<128x128xbf16>, vector<8x128xf32> -> vector<8x128xf32>
    %c0_31 = arith.constant 0 : index
    %c0_32 = arith.constant 0 : index
    %c0_33 = arith.constant 0 : index
    %87 = vector.load %arg7[%c0_31, %c0_32, %c0_33] : memref<2x1x128xf32, #tpu.memory_space<vmem>>, vector<1x1x128xf32>
    %88 = vector.shape_cast %87 : vector<1x1x128xf32> to vector<1x128xf32>
    %89 = vector.broadcast %88 : vector<1x128xf32> to vector<8x128xf32>
    %90 = arith.addf %86, %89 : vector<8x128xf32>
    %91 = arith.addf %25, %90 : vector<8x128xf32>
    %c0_34 = arith.constant 0 : index
    %c0_35 = arith.constant 0 : index
    %c0_36 = arith.constant 0 : index
    %92 = vector.load %arg8[%c0_34, %c0_35, %c0_36] : memref<2x2x128xf32, #tpu.memory_space<vmem>>, vector<1x2x128xf32>
    %93 = vector.shape_cast %92 : vector<1x2x128xf32> to vector<2x128xf32>
    %94 = vector.extract_strided_slice %93 {offsets = [0, 0], sizes = [1, 128], strides = [1, 1]} : vector<2x128xf32> to vector<1x128xf32>
    %95 = vector.extract_strided_slice %93 {offsets = [1, 0], sizes = [1, 128], strides = [1, 1]} : vector<2x128xf32> to vector<1x128xf32>
    %cst_37 = arith.constant dense<0.000000e+00> : vector<8xf32>
    %96 = vector.multi_reduction <add>, %91, %cst_37 [1] : vector<8x128xf32> to vector<8xf32>
    %97 = vector.shape_cast %96 : vector<8xf32> to vector<8x1xf32>
    %cst_38 = arith.constant 1.280000e+02 : f32
    %98 = vector.broadcast %cst_38 : f32 to vector<8x1xf32>
    %99 = arith.divf %97, %98 : vector<8x1xf32>
    %100 = vector.broadcast %99 : vector<8x1xf32> to vector<8x128xf32>
    %101 = arith.subf %91, %100 : vector<8x128xf32>
    %102 = arith.mulf %101, %101 : vector<8x128xf32>
    %cst_39 = arith.constant dense<0.000000e+00> : vector<8xf32>
    %103 = vector.multi_reduction <add>, %102, %cst_39 [1] : vector<8x128xf32> to vector<8xf32>
    %104 = vector.shape_cast %103 : vector<8xf32> to vector<8x1xf32>
    %cst_40 = arith.constant 1.280000e+02 : f32
    %105 = vector.broadcast %cst_40 : f32 to vector<8x1xf32>
    %106 = arith.divf %104, %105 : vector<8x1xf32>
    %107 = vector.broadcast %99 : vector<8x1xf32> to vector<8x128xf32>
    %108 = arith.subf %91, %107 : vector<8x128xf32>
    %cst_41 = arith.constant 9.99999996E-13 : f32
    %109 = vector.broadcast %cst_41 : f32 to vector<8x1xf32>
    %110 = arith.addf %106, %109 : vector<8x1xf32>
    %111 = math.rsqrt %110 : vector<8x1xf32>
    %112 = vector.broadcast %111 : vector<8x1xf32> to vector<8x128xf32>
    %113 = arith.mulf %108, %112 : vector<8x128xf32>
    %114 = vector.broadcast %94 : vector<1x128xf32> to vector<8x128xf32>
    %115 = arith.mulf %113, %114 : vector<8x128xf32>
    %116 = vector.broadcast %95 : vector<1x128xf32> to vector<8x128xf32>
    %117 = arith.addf %115, %116 : vector<8x128xf32>
    %118 = arith.truncf %117 : vector<8x128xf32> to vector<8x128xbf16>
    %c0_42 = arith.constant 0 : index
    %c0_43 = arith.constant 0 : index
    %c0_44 = arith.constant 0 : index
    %119 = vector.load %arg9[%c0_42, %c0_43, %c0_44] : memref<2x128x256xbf16, #tpu.memory_space<vmem>>, vector<1x128x256xbf16>
    %120 = vector.shape_cast %119 : vector<1x128x256xbf16> to vector<128x256xbf16>
    %cst_45 = arith.constant dense<0.000000e+00> : vector<8x256xf32>
    %121 = tpu.matmul %118, %120, %cst_45 {dimension_numbers = #tpu.dot_dimension_numbers<[1], [0], [0], [1], [0, 0, 1, 1], [], []>} : vector<8x128xbf16>, vector<128x256xbf16>, vector<8x256xf32> -> vector<8x256xf32>
    %c0_46 = arith.constant 0 : index
    %c0_47 = arith.constant 0 : index
    %c0_48 = arith.constant 0 : index
    %122 = vector.load %arg10[%c0_46, %c0_47, %c0_48] : memref<2x1x256xf32, #tpu.memory_space<vmem>>, vector<1x1x256xf32>
    %123 = vector.shape_cast %122 : vector<1x1x256xf32> to vector<1x256xf32>
    %124 = vector.broadcast %123 : vector<1x256xf32> to vector<8x256xf32>
    %125 = arith.addf %121, %124 : vector<8x256xf32>
    %126 = arith.mulf %125, %125 : vector<8x256xf32>
    %127 = arith.mulf %125, %126 : vector<8x256xf32>
    %cst_49 = arith.constant 4.471500e-02 : f32
    %128 = vector.broadcast %cst_49 : f32 to vector<8x256xf32>
    %129 = arith.mulf %128, %127 : vector<8x256xf32>
    %130 = arith.addf %125, %129 : vector<8x256xf32>
    %cst_50 = arith.constant 0.797884583 : f32
    %131 = vector.broadcast %cst_50 : f32 to vector<8x256xf32>
    %132 = arith.mulf %131, %130 : vector<8x256xf32>
    %133 = math.tanh %132 : vector<8x256xf32>
    %cst_51 = arith.constant 1.000000e+00 : f32
    %134 = vector.broadcast %cst_51 : f32 to vector<8x256xf32>
    %135 = arith.addf %134, %133 : vector<8x256xf32>
    %cst_52 = arith.constant 5.000000e-01 : f32
    %136 = vector.broadcast %cst_52 : f32 to vector<8x256xf32>
    %137 = arith.mulf %136, %135 : vector<8x256xf32>
    %138 = arith.mulf %125, %137 : vector<8x256xf32>
    %139 = arith.truncf %138 : vector<8x256xf32> to vector<8x256xbf16>
    %c0_53 = arith.constant 0 : index
    %c0_54 = arith.constant 0 : index
    %c0_55 = arith.constant 0 : index
    %140 = vector.load %arg11[%c0_53, %c0_54, %c0_55] : memref<2x256x128xbf16, #tpu.memory_space<vmem>>, vector<1x256x128xbf16>
    %141 = vector.shape_cast %140 : vector<1x256x128xbf16> to vector<256x128xbf16>
    %cst_56 = arith.constant dense<0.000000e+00> : vector<8x128xf32>
    %142 = tpu.matmul %139, %141, %cst_56 {dimension_numbers = #tpu.dot_dimension_numbers<[1], [0], [0], [1], [0, 0, 1, 1], [], []>} : vector<8x256xbf16>, vector<256x128xbf16>, vector<8x128xf32> -> vector<8x128xf32>
    %c0_57 = arith.constant 0 : index
    %c0_58 = arith.constant 0 : index
    %c0_59 = arith.constant 0 : index
    %143 = vector.load %arg12[%c0_57, %c0_58, %c0_59] : memref<2x1x128xf32, #tpu.memory_space<vmem>>, vector<1x1x128xf32>
    %144 = vector.shape_cast %143 : vector<1x1x128xf32> to vector<1x128xf32>
    %145 = vector.broadcast %144 : vector<1x128xf32> to vector<8x128xf32>
    %146 = arith.addf %142, %145 : vector<8x128xf32>
    %147 = arith.addf %117, %146 : vector<8x128xf32>
    %c0_60 = arith.constant 0 : index
    %c0_61 = arith.constant 0 : index
    %c0_62 = arith.constant 0 : index
    %148 = vector.load %arg13[%c0_60, %c0_61, %c0_62] : memref<2x2x128xf32, #tpu.memory_space<vmem>>, vector<1x2x128xf32>
    %149 = vector.shape_cast %148 : vector<1x2x128xf32> to vector<2x128xf32>
    %150 = vector.extract_strided_slice %149 {offsets = [0, 0], sizes = [1, 128], strides = [1, 1]} : vector<2x128xf32> to vector<1x128xf32>
    %151 = vector.extract_strided_slice %149 {offsets = [1, 0], sizes = [1, 128], strides = [1, 1]} : vector<2x128xf32> to vector<1x128xf32>
    %cst_63 = arith.constant dense<0.000000e+00> : vector<8xf32>
    %152 = vector.multi_reduction <add>, %147, %cst_63 [1] : vector<8x128xf32> to vector<8xf32>
    %153 = vector.shape_cast %152 : vector<8xf32> to vector<8x1xf32>
    %cst_64 = arith.constant 1.280000e+02 : f32
    %154 = vector.broadcast %cst_64 : f32 to vector<8x1xf32>
    %155 = arith.divf %153, %154 : vector<8x1xf32>
    %156 = vector.broadcast %155 : vector<8x1xf32> to vector<8x128xf32>
    %157 = arith.subf %147, %156 : vector<8x128xf32>
    %158 = arith.mulf %157, %157 : vector<8x128xf32>
    %cst_65 = arith.constant dense<0.000000e+00> : vector<8xf32>
    %159 = vector.multi_reduction <add>, %158, %cst_65 [1] : vector<8x128xf32> to vector<8xf32>
    %160 = vector.shape_cast %159 : vector<8xf32> to vector<8x1xf32>
    %cst_66 = arith.constant 1.280000e+02 : f32
    %161 = vector.broadcast %cst_66 : f32 to vector<8x1xf32>
    %162 = arith.divf %160, %161 : vector<8x1xf32>
    %163 = vector.broadcast %155 : vector<8x1xf32> to vector<8x128xf32>
    %164 = arith.subf %147, %163 : vector<8x128xf32>
    %cst_67 = arith.constant 9.99999996E-13 : f32
    %165 = vector.broadcast %cst_67 : f32 to vector<8x1xf32>
    %166 = arith.addf %162, %165 : vector<8x1xf32>
    %167 = math.rsqrt %166 : vector<8x1xf32>
    %168 = vector.broadcast %167 : vector<8x1xf32> to vector<8x128xf32>
    %169 = arith.mulf %164, %168 : vector<8x128xf32>
    %170 = vector.broadcast %150 : vector<1x128xf32> to vector<8x128xf32>
    %171 = arith.mulf %169, %170 : vector<8x128xf32>
    %172 = vector.broadcast %151 : vector<1x128xf32> to vector<8x128xf32>
    %173 = arith.addf %171, %172 : vector<8x128xf32>
    %174 = arith.truncf %173 : vector<8x128xf32> to vector<8x128xbf16>
    %c1 = arith.constant 1 : index
    %c0_68 = arith.constant 0 : index
    %c0_69 = arith.constant 0 : index
    %175 = vector.load %arg4[%c1, %c0_68, %c0_69] : memref<2x128x384xbf16, #tpu.memory_space<vmem>>, vector<1x128x384xbf16>
    %176 = vector.shape_cast %175 : vector<1x128x384xbf16> to vector<128x384xbf16>
    %cst_70 = arith.constant dense<0.000000e+00> : vector<8x384xf32>
    %177 = tpu.matmul %174, %176, %cst_70 {dimension_numbers = #tpu.dot_dimension_numbers<[1], [0], [0], [1], [0, 0, 1, 1], [], []>} : vector<8x128xbf16>, vector<128x384xbf16>, vector<8x384xf32> -> vector<8x384xf32>
    %c1_71 = arith.constant 1 : index
    %c0_72 = arith.constant 0 : index
    %c0_73 = arith.constant 0 : index
    %178 = vector.load %arg5[%c1_71, %c0_72, %c0_73] : memref<2x1x384xf32, #tpu.memory_space<vmem>>, vector<1x1x384xf32>
    %179 = vector.shape_cast %178 : vector<1x1x384xf32> to vector<1x384xf32>
    %180 = vector.broadcast %179 : vector<1x384xf32> to vector<8x384xf32>
    %181 = arith.addf %177, %180 : vector<8x384xf32>
    %182 = vector.extract_strided_slice %181 {offsets = [0, 0], sizes = [8, 32], strides = [1, 1]} : vector<8x384xf32> to vector<8x32xf32>
    %183 = vector.extract_strided_slice %181 {offsets = [0, 128], sizes = [8, 32], strides = [1, 1]} : vector<8x384xf32> to vector<8x32xf32>
    %cst_74 = arith.constant dense<0.000000e+00> : vector<8x8xf32>
    %184 = tpu.matmul %182, %183, %cst_74 {dimension_numbers = #tpu.dot_dimension_numbers<[1], [1], [0], [0], [0, 0, 1, 0], [], []>} : vector<8x32xf32>, vector<8x32xf32>, vector<8x8xf32> -> vector<8x8xf32>
    %185 = vector.extract_strided_slice %181 {offsets = [0, 32], sizes = [8, 32], strides = [1, 1]} : vector<8x384xf32> to vector<8x32xf32>
    %186 = vector.extract_strided_slice %181 {offsets = [0, 160], sizes = [8, 32], strides = [1, 1]} : vector<8x384xf32> to vector<8x32xf32>
    %cst_75 = arith.constant dense<0.000000e+00> : vector<8x8xf32>
    %187 = tpu.matmul %185, %186, %cst_75 {dimension_numbers = #tpu.dot_dimension_numbers<[1], [1], [0], [0], [0, 0, 1, 0], [], []>} : vector<8x32xf32>, vector<8x32xf32>, vector<8x8xf32> -> vector<8x8xf32>
    %188 = vector.extract_strided_slice %181 {offsets = [0, 64], sizes = [8, 32], strides = [1, 1]} : vector<8x384xf32> to vector<8x32xf32>
    %189 = vector.extract_strided_slice %181 {offsets = [0, 192], sizes = [8, 32], strides = [1, 1]} : vector<8x384xf32> to vector<8x32xf32>
    %cst_76 = arith.constant dense<0.000000e+00> : vector<8x8xf32>
    %190 = tpu.matmul %188, %189, %cst_76 {dimension_numbers = #tpu.dot_dimension_numbers<[1], [1], [0], [0], [0, 0, 1, 0], [], []>} : vector<8x32xf32>, vector<8x32xf32>, vector<8x8xf32> -> vector<8x8xf32>
    %191 = vector.extract_strided_slice %181 {offsets = [0, 96], sizes = [8, 32], strides = [1, 1]} : vector<8x384xf32> to vector<8x32xf32>
    %192 = vector.extract_strided_slice %181 {offsets = [0, 224], sizes = [8, 32], strides = [1, 1]} : vector<8x384xf32> to vector<8x32xf32>
    %cst_77 = arith.constant dense<0.000000e+00> : vector<8x8xf32>
    %193 = tpu.matmul %191, %192, %cst_77 {dimension_numbers = #tpu.dot_dimension_numbers<[1], [1], [0], [0], [0, 0, 1, 0], [], []>} : vector<8x32xf32>, vector<8x32xf32>, vector<8x8xf32> -> vector<8x8xf32>
    %194 = tpu.concatenate %184, %187, %190, %193 in 0 : vector<8x8xf32>, vector<8x8xf32>, vector<8x8xf32>, vector<8x8xf32> -> vector<32x8xf32>
    %cst_78 = arith.constant 0.176776692 : f32
    %195 = vector.broadcast %cst_78 : f32 to vector<32x8xf32>
    %196 = arith.mulf %194, %195 : vector<32x8xf32>
    %197 = vector.broadcast %26 : vector<1x8xf32> to vector<32x8xf32>
    %198 = arith.addf %196, %197 : vector<32x8xf32>
    %cst_79 = arith.constant dense<0xFF800000> : vector<32xf32>
    %199 = vector.multi_reduction <maximumf>, %198, %cst_79 [1] : vector<32x8xf32> to vector<32xf32>
    %200 = vector.shape_cast %199 : vector<32xf32> to vector<32x1xf32>
    %201 = vector.broadcast %200 : vector<32x1xf32> to vector<32x8xf32>
    %202 = arith.subf %198, %201 : vector<32x8xf32>
    %203 = math.exp %202 : vector<32x8xf32>
    %cst_80 = arith.constant dense<0.000000e+00> : vector<32xf32>
    %204 = vector.multi_reduction <add>, %203, %cst_80 [1] : vector<32x8xf32> to vector<32xf32>
    %205 = vector.shape_cast %204 : vector<32xf32> to vector<32x1xf32>
    %206 = tpu.reciprocal %205 {approx = true} : vector<32x1xf32> -> vector<32x1xf32>
    %207 = vector.broadcast %206 : vector<32x1xf32> to vector<32x8xf32>
    %208 = arith.mulf %203, %207 : vector<32x8xf32>
    %209 = vector.extract_strided_slice %208 {offsets = [0, 0], sizes = [8, 8], strides = [1, 1]} : vector<32x8xf32> to vector<8x8xf32>
    %210 = arith.truncf %209 : vector<8x8xf32> to vector<8x8xbf16>
    %211 = vector.extract_strided_slice %181 {offsets = [0, 256], sizes = [8, 32], strides = [1, 1]} : vector<8x384xf32> to vector<8x32xf32>
    %212 = arith.truncf %211 : vector<8x32xf32> to vector<8x32xbf16>
    %cst_81 = arith.constant dense<0.000000e+00> : vector<8x32xf32>
    %213 = tpu.matmul %210, %212, %cst_81 {dimension_numbers = #tpu.dot_dimension_numbers<[1], [0], [0], [1], [0, 0, 1, 1], [], []>} : vector<8x8xbf16>, vector<8x32xbf16>, vector<8x32xf32> -> vector<8x32xf32>
    %214 = vector.extract_strided_slice %208 {offsets = [8, 0], sizes = [8, 8], strides = [1, 1]} : vector<32x8xf32> to vector<8x8xf32>
    %215 = arith.truncf %214 : vector<8x8xf32> to vector<8x8xbf16>
    %216 = vector.extract_strided_slice %181 {offsets = [0, 288], sizes = [8, 32], strides = [1, 1]} : vector<8x384xf32> to vector<8x32xf32>
    %217 = arith.truncf %216 : vector<8x32xf32> to vector<8x32xbf16>
    %cst_82 = arith.constant dense<0.000000e+00> : vector<8x32xf32>
    %218 = tpu.matmul %215, %217, %cst_82 {dimension_numbers = #tpu.dot_dimension_numbers<[1], [0], [0], [1], [0, 0, 1, 1], [], []>} : vector<8x8xbf16>, vector<8x32xbf16>, vector<8x32xf32> -> vector<8x32xf32>
    %219 = vector.extract_strided_slice %208 {offsets = [16, 0], sizes = [8, 8], strides = [1, 1]} : vector<32x8xf32> to vector<8x8xf32>
    %220 = arith.truncf %219 : vector<8x8xf32> to vector<8x8xbf16>
    %221 = vector.extract_strided_slice %181 {offsets = [0, 320], sizes = [8, 32], strides = [1, 1]} : vector<8x384xf32> to vector<8x32xf32>
    %222 = arith.truncf %221 : vector<8x32xf32> to vector<8x32xbf16>
    %cst_83 = arith.constant dense<0.000000e+00> : vector<8x32xf32>
    %223 = tpu.matmul %220, %222, %cst_83 {dimension_numbers = #tpu.dot_dimension_numbers<[1], [0], [0], [1], [0, 0, 1, 1], [], []>} : vector<8x8xbf16>, vector<8x32xbf16>, vector<8x32xf32> -> vector<8x32xf32>
    %224 = vector.extract_strided_slice %208 {offsets = [24, 0], sizes = [8, 8], strides = [1, 1]} : vector<32x8xf32> to vector<8x8xf32>
    %225 = arith.truncf %224 : vector<8x8xf32> to vector<8x8xbf16>
    %226 = vector.extract_strided_slice %181 {offsets = [0, 352], sizes = [8, 32], strides = [1, 1]} : vector<8x384xf32> to vector<8x32xf32>
    %227 = arith.truncf %226 : vector<8x32xf32> to vector<8x32xbf16>
    %cst_84 = arith.constant dense<0.000000e+00> : vector<8x32xf32>
    %228 = tpu.matmul %225, %227, %cst_84 {dimension_numbers = #tpu.dot_dimension_numbers<[1], [0], [0], [1], [0, 0, 1, 1], [], []>} : vector<8x8xbf16>, vector<8x32xbf16>, vector<8x32xf32> -> vector<8x32xf32>
    %229 = tpu.concatenate %213, %218, %223, %228 in 1 : vector<8x32xf32>, vector<8x32xf32>, vector<8x32xf32>, vector<8x32xf32> -> vector<8x128xf32>
    %230 = arith.truncf %229 : vector<8x128xf32> to vector<8x128xbf16>
    %c1_85 = arith.constant 1 : index
    %c0_86 = arith.constant 0 : index
    %c0_87 = arith.constant 0 : index
    %231 = vector.load %arg6[%c1_85, %c0_86, %c0_87] : memref<2x128x128xbf16, #tpu.memory_space<vmem>>, vector<1x128x128xbf16>
    %232 = vector.shape_cast %231 : vector<1x128x128xbf16> to vector<128x128xbf16>
    %cst_88 = arith.constant dense<0.000000e+00> : vector<8x128xf32>
    %233 = tpu.matmul %230, %232, %cst_88 {dimension_numbers = #tpu.dot_dimension_numbers<[1], [0], [0], [1], [0, 0, 1, 1], [], []>} : vector<8x128xbf16>, vector<128x128xbf16>, vector<8x128xf32> -> vector<8x128xf32>
    %c1_89 = arith.constant 1 : index
    %c0_90 = arith.constant 0 : index
    %c0_91 = arith.constant 0 : index
    %234 = vector.load %arg7[%c1_89, %c0_90, %c0_91] : memref<2x1x128xf32, #tpu.memory_space<vmem>>, vector<1x1x128xf32>
    %235 = vector.shape_cast %234 : vector<1x1x128xf32> to vector<1x128xf32>
    %236 = vector.broadcast %235 : vector<1x128xf32> to vector<8x128xf32>
    %237 = arith.addf %233, %236 : vector<8x128xf32>
    %238 = arith.addf %173, %237 : vector<8x128xf32>
    %c1_92 = arith.constant 1 : index
    %c0_93 = arith.constant 0 : index
    %c0_94 = arith.constant 0 : index
    %239 = vector.load %arg8[%c1_92, %c0_93, %c0_94] : memref<2x2x128xf32, #tpu.memory_space<vmem>>, vector<1x2x128xf32>
    %240 = vector.shape_cast %239 : vector<1x2x128xf32> to vector<2x128xf32>
    %241 = vector.extract_strided_slice %240 {offsets = [0, 0], sizes = [1, 128], strides = [1, 1]} : vector<2x128xf32> to vector<1x128xf32>
    %242 = vector.extract_strided_slice %240 {offsets = [1, 0], sizes = [1, 128], strides = [1, 1]} : vector<2x128xf32> to vector<1x128xf32>
    %cst_95 = arith.constant dense<0.000000e+00> : vector<8xf32>
    %243 = vector.multi_reduction <add>, %238, %cst_95 [1] : vector<8x128xf32> to vector<8xf32>
    %244 = vector.shape_cast %243 : vector<8xf32> to vector<8x1xf32>
    %cst_96 = arith.constant 1.280000e+02 : f32
    %245 = vector.broadcast %cst_96 : f32 to vector<8x1xf32>
    %246 = arith.divf %244, %245 : vector<8x1xf32>
    %247 = vector.broadcast %246 : vector<8x1xf32> to vector<8x128xf32>
    %248 = arith.subf %238, %247 : vector<8x128xf32>
    %249 = arith.mulf %248, %248 : vector<8x128xf32>
    %cst_97 = arith.constant dense<0.000000e+00> : vector<8xf32>
    %250 = vector.multi_reduction <add>, %249, %cst_97 [1] : vector<8x128xf32> to vector<8xf32>
    %251 = vector.shape_cast %250 : vector<8xf32> to vector<8x1xf32>
    %cst_98 = arith.constant 1.280000e+02 : f32
    %252 = vector.broadcast %cst_98 : f32 to vector<8x1xf32>
    %253 = arith.divf %251, %252 : vector<8x1xf32>
    %254 = vector.broadcast %246 : vector<8x1xf32> to vector<8x128xf32>
    %255 = arith.subf %238, %254 : vector<8x128xf32>
    %cst_99 = arith.constant 9.99999996E-13 : f32
    %256 = vector.broadcast %cst_99 : f32 to vector<8x1xf32>
    %257 = arith.addf %253, %256 : vector<8x1xf32>
    %258 = math.rsqrt %257 : vector<8x1xf32>
    %259 = vector.broadcast %258 : vector<8x1xf32> to vector<8x128xf32>
    %260 = arith.mulf %255, %259 : vector<8x128xf32>
    %261 = vector.broadcast %241 : vector<1x128xf32> to vector<8x128xf32>
    %262 = arith.mulf %260, %261 : vector<8x128xf32>
    %263 = vector.broadcast %242 : vector<1x128xf32> to vector<8x128xf32>
    %264 = arith.addf %262, %263 : vector<8x128xf32>
    %265 = arith.truncf %264 : vector<8x128xf32> to vector<8x128xbf16>
    %c1_100 = arith.constant 1 : index
    %c0_101 = arith.constant 0 : index
    %c0_102 = arith.constant 0 : index
    %266 = vector.load %arg9[%c1_100, %c0_101, %c0_102] : memref<2x128x256xbf16, #tpu.memory_space<vmem>>, vector<1x128x256xbf16>
    %267 = vector.shape_cast %266 : vector<1x128x256xbf16> to vector<128x256xbf16>
    %cst_103 = arith.constant dense<0.000000e+00> : vector<8x256xf32>
    %268 = tpu.matmul %265, %267, %cst_103 {dimension_numbers = #tpu.dot_dimension_numbers<[1], [0], [0], [1], [0, 0, 1, 1], [], []>} : vector<8x128xbf16>, vector<128x256xbf16>, vector<8x256xf32> -> vector<8x256xf32>
    %c1_104 = arith.constant 1 : index
    %c0_105 = arith.constant 0 : index
    %c0_106 = arith.constant 0 : index
    %269 = vector.load %arg10[%c1_104, %c0_105, %c0_106] : memref<2x1x256xf32, #tpu.memory_space<vmem>>, vector<1x1x256xf32>
    %270 = vector.shape_cast %269 : vector<1x1x256xf32> to vector<1x256xf32>
    %271 = vector.broadcast %270 : vector<1x256xf32> to vector<8x256xf32>
    %272 = arith.addf %268, %271 : vector<8x256xf32>
    %273 = arith.mulf %272, %272 : vector<8x256xf32>
    %274 = arith.mulf %272, %273 : vector<8x256xf32>
    %cst_107 = arith.constant 4.471500e-02 : f32
    %275 = vector.broadcast %cst_107 : f32 to vector<8x256xf32>
    %276 = arith.mulf %275, %274 : vector<8x256xf32>
    %277 = arith.addf %272, %276 : vector<8x256xf32>
    %cst_108 = arith.constant 0.797884583 : f32
    %278 = vector.broadcast %cst_108 : f32 to vector<8x256xf32>
    %279 = arith.mulf %278, %277 : vector<8x256xf32>
    %280 = math.tanh %279 : vector<8x256xf32>
    %cst_109 = arith.constant 1.000000e+00 : f32
    %281 = vector.broadcast %cst_109 : f32 to vector<8x256xf32>
    %282 = arith.addf %281, %280 : vector<8x256xf32>
    %cst_110 = arith.constant 5.000000e-01 : f32
    %283 = vector.broadcast %cst_110 : f32 to vector<8x256xf32>
    %284 = arith.mulf %283, %282 : vector<8x256xf32>
    %285 = arith.mulf %272, %284 : vector<8x256xf32>
    %286 = arith.truncf %285 : vector<8x256xf32> to vector<8x256xbf16>
    %c1_111 = arith.constant 1 : index
    %c0_112 = arith.constant 0 : index
    %c0_113 = arith.constant 0 : index
    %287 = vector.load %arg11[%c1_111, %c0_112, %c0_113] : memref<2x256x128xbf16, #tpu.memory_space<vmem>>, vector<1x256x128xbf16>
    %288 = vector.shape_cast %287 : vector<1x256x128xbf16> to vector<256x128xbf16>
    %cst_114 = arith.constant dense<0.000000e+00> : vector<8x128xf32>
    %289 = tpu.matmul %286, %288, %cst_114 {dimension_numbers = #tpu.dot_dimension_numbers<[1], [0], [0], [1], [0, 0, 1, 1], [], []>} : vector<8x256xbf16>, vector<256x128xbf16>, vector<8x128xf32> -> vector<8x128xf32>
    %c1_115 = arith.constant 1 : index
    %c0_116 = arith.constant 0 : index
    %c0_117 = arith.constant 0 : index
    %290 = vector.load %arg12[%c1_115, %c0_116, %c0_117] : memref<2x1x128xf32, #tpu.memory_space<vmem>>, vector<1x1x128xf32>
    %291 = vector.shape_cast %290 : vector<1x1x128xf32> to vector<1x128xf32>
    %292 = vector.broadcast %291 : vector<1x128xf32> to vector<8x128xf32>
    %293 = arith.addf %289, %292 : vector<8x128xf32>
    %294 = arith.addf %264, %293 : vector<8x128xf32>
    %c1_118 = arith.constant 1 : index
    %c0_119 = arith.constant 0 : index
    %c0_120 = arith.constant 0 : index
    %295 = vector.load %arg13[%c1_118, %c0_119, %c0_120] : memref<2x2x128xf32, #tpu.memory_space<vmem>>, vector<1x2x128xf32>
    %296 = vector.shape_cast %295 : vector<1x2x128xf32> to vector<2x128xf32>
    %297 = vector.extract_strided_slice %296 {offsets = [0, 0], sizes = [1, 128], strides = [1, 1]} : vector<2x128xf32> to vector<1x128xf32>
    %298 = vector.extract_strided_slice %296 {offsets = [1, 0], sizes = [1, 128], strides = [1, 1]} : vector<2x128xf32> to vector<1x128xf32>
    %cst_121 = arith.constant dense<0.000000e+00> : vector<8xf32>
    %299 = vector.multi_reduction <add>, %294, %cst_121 [1] : vector<8x128xf32> to vector<8xf32>
    %300 = vector.shape_cast %299 : vector<8xf32> to vector<8x1xf32>
    %cst_122 = arith.constant 1.280000e+02 : f32
    %301 = vector.broadcast %cst_122 : f32 to vector<8x1xf32>
    %302 = arith.divf %300, %301 : vector<8x1xf32>
    %303 = vector.broadcast %302 : vector<8x1xf32> to vector<8x128xf32>
    %304 = arith.subf %294, %303 : vector<8x128xf32>
    %305 = arith.mulf %304, %304 : vector<8x128xf32>
    %cst_123 = arith.constant dense<0.000000e+00> : vector<8xf32>
    %306 = vector.multi_reduction <add>, %305, %cst_123 [1] : vector<8x128xf32> to vector<8xf32>
    %307 = vector.shape_cast %306 : vector<8xf32> to vector<8x1xf32>
    %cst_124 = arith.constant 1.280000e+02 : f32
    %308 = vector.broadcast %cst_124 : f32 to vector<8x1xf32>
    %309 = arith.divf %307, %308 : vector<8x1xf32>
    %310 = vector.broadcast %302 : vector<8x1xf32> to vector<8x128xf32>
    %311 = arith.subf %294, %310 : vector<8x128xf32>
    %cst_125 = arith.constant 9.99999996E-13 : f32
    %312 = vector.broadcast %cst_125 : f32 to vector<8x1xf32>
    %313 = arith.addf %309, %312 : vector<8x1xf32>
    %314 = math.rsqrt %313 : vector<8x1xf32>
    %315 = vector.broadcast %314 : vector<8x1xf32> to vector<8x128xf32>
    %316 = arith.mulf %311, %315 : vector<8x128xf32>
    %317 = vector.broadcast %297 : vector<1x128xf32> to vector<8x128xf32>
    %318 = arith.mulf %316, %317 : vector<8x128xf32>
    %319 = vector.broadcast %298 : vector<1x128xf32> to vector<8x128xf32>
    %320 = arith.addf %318, %319 : vector<8x128xf32>
    %321 = vector.extract_strided_slice %320 {offsets = [0, 0], sizes = [1, 128], strides = [1, 1]} : vector<8x128xf32> to vector<1x128xf32>
    %c0_126 = arith.constant 0 : index
    %c0_127 = arith.constant 0 : index
    %322 = vector.load %arg14[%c0_126, %c0_127] : memref<1x128xf32, #tpu.memory_space<vmem>>, vector<1x128xf32>
    %323 = arith.mulf %321, %322 : vector<1x128xf32>
    %cst_128 = arith.constant dense<0.000000e+00> : vector<1xf32>
    %324 = vector.multi_reduction <add>, %323, %cst_128 [1] : vector<1x128xf32> to vector<1xf32>
    %325 = vector.shape_cast %324 : vector<1xf32> to vector<1x1xf32>
    %c0_129 = arith.constant 0 : index
    %c0_130 = arith.constant 0 : index
    %326 = vector.load %arg15[%c0_129, %c0_130] : memref<1x1xf32, #tpu.memory_space<vmem>>, vector<1x1xf32>
    %327 = arith.addf %325, %326 : vector<1x1xf32>
    %328 = arith.negf %327 : vector<1x1xf32>
    %329 = math.exp %328 : vector<1x1xf32>
    %cst_131 = arith.constant 1.000000e+00 : f32
    %330 = vector.broadcast %cst_131 : f32 to vector<1x1xf32>
    %331 = arith.addf %330, %329 : vector<1x1xf32>
    %332 = arith.divf %330, %331 : vector<1x1xf32>
    %c0_132 = arith.constant 0 : index
    %c0_133 = arith.constant 0 : index
    %333 = vector.load %arg16[%c0_132, %c0_133] : memref<1x1xf32, #tpu.memory_space<vmem>>, vector<1x1xf32>
    tpu.vector_store %arg16[%c0_132, %c0_133], %332 {strides = array<i32>} : memref<1x1xf32, #tpu.memory_space<vmem>>, vector<1x1xf32>,
    return
  }
  func.func @transform_0(%arg0: i32) -> (i32, i32) {
    %c0_i32 = arith.constant 0 : i32
    %c0_i32_0 = arith.constant 0 : i32
    %c0_i32_1 = arith.constant 0 : i32
    return %c0_i32, %c0_i32_0 : i32, i32
  }
  func.func @transform_1(%arg0: i32) -> (i32, i32) {
    %c0_i32 = arith.constant 0 : i32
    %c0_i32_0 = arith.constant 0 : i32
    %c0_i32_1 = arith.constant 0 : i32
    return %c0_i32, %c0_i32_0 : i32, i32
  }
  func.func @transform_2(%arg0: i32) -> (i32, i32) {
    %c0_i32 = arith.constant 0 : i32
    %c0_i32_0 = arith.constant 0 : i32
    %c0_i32_1 = arith.constant 0 : i32
    return %c0_i32, %c0_i32_0 : i32, i32
  }
  func.func @transform_3(%arg0: i32) -> (i32, i32, i32) {
    %c0_i32 = arith.constant 0 : i32
    %c0_i32_0 = arith.constant 0 : i32
    %c0_i32_1 = arith.constant 0 : i32
    %c0_i32_2 = arith.constant 0 : i32
    return %c0_i32, %c0_i32_0, %c0_i32_1 : i32, i32, i32
  }
  func.func @transform_4(%arg0: i32) -> (i32, i32, i32) {
    %c0_i32 = arith.constant 0 : i32
    %c0_i32_0 = arith.constant 0 : i32
    %c0_i32_1 = arith.constant 0 : i32
    %c0_i32_2 = arith.constant 0 : i32
    return %c0_i32, %c0_i32_0, %c0_i32_1 : i32, i32, i32
  }
  func.func @transform_5(%arg0: i32) -> (i32, i32, i32) {
    %c0_i32 = arith.constant 0 : i32
    %c0_i32_0 = arith.constant 0 : i32
    %c0_i32_1 = arith.constant 0 : i32
    %c0_i32_2 = arith.constant 0 : i32
    return %c0_i32, %c0_i32_0, %c0_i32_1 : i32, i32, i32
  }
  func.func @transform_6(%arg0: i32) -> (i32, i32, i32) {
    %c0_i32 = arith.constant 0 : i32
    %c0_i32_0 = arith.constant 0 : i32
    %c0_i32_1 = arith.constant 0 : i32
    %c0_i32_2 = arith.constant 0 : i32
    return %c0_i32, %c0_i32_0, %c0_i32_1 : i32, i32, i32
  }
  func.func @transform_7(%arg0: i32) -> (i32, i32, i32) {
    %c0_i32 = arith.constant 0 : i32
    %c0_i32_0 = arith.constant 0 : i32
    %c0_i32_1 = arith.constant 0 : i32
    %c0_i32_2 = arith.constant 0 : i32
    return %c0_i32, %c0_i32_0, %c0_i32_1 : i32, i32, i32
  }
  func.func @transform_8(%arg0: i32) -> (i32, i32, i32) {
    %c0_i32 = arith.constant 0 : i32
    %c0_i32_0 = arith.constant 0 : i32
    %c0_i32_1 = arith.constant 0 : i32
    %c0_i32_2 = arith.constant 0 : i32
    return %c0_i32, %c0_i32_0, %c0_i32_1 : i32, i32, i32
  }
  func.func @transform_9(%arg0: i32) -> (i32, i32, i32) {
    %c0_i32 = arith.constant 0 : i32
    %c0_i32_0 = arith.constant 0 : i32
    %c0_i32_1 = arith.constant 0 : i32
    %c0_i32_2 = arith.constant 0 : i32
    return %c0_i32, %c0_i32_0, %c0_i32_1 : i32, i32, i32
  }
  func.func @transform_10(%arg0: i32) -> (i32, i32, i32) {
    %c0_i32 = arith.constant 0 : i32
    %c0_i32_0 = arith.constant 0 : i32
    %c0_i32_1 = arith.constant 0 : i32
    %c0_i32_2 = arith.constant 0 : i32
    return %c0_i32, %c0_i32_0, %c0_i32_1 : i32, i32, i32
  }
  func.func @transform_11(%arg0: i32) -> (i32, i32, i32) {
    %c0_i32 = arith.constant 0 : i32
    %c0_i32_0 = arith.constant 0 : i32
    %c0_i32_1 = arith.constant 0 : i32
    %c0_i32_2 = arith.constant 0 : i32
    return %c0_i32, %c0_i32_0, %c0_i32_1 : i32, i32, i32
  }
  func.func @transform_12(%arg0: i32) -> (i32, i32, i32) {
    %c0_i32 = arith.constant 0 : i32
    %c0_i32_0 = arith.constant 0 : i32
    %c0_i32_1 = arith.constant 0 : i32
    %c0_i32_2 = arith.constant 0 : i32
    return %c0_i32, %c0_i32_0, %c0_i32_1 : i32, i32, i32
  }
  func.func @transform_13(%arg0: i32) -> (i32, i32) {
    %c0_i32 = arith.constant 0 : i32
    %c0_i32_0 = arith.constant 0 : i32
    %c0_i32_1 = arith.constant 0 : i32
    return %c0_i32, %c0_i32_0 : i32, i32
  }
  func.func @transform_14(%arg0: i32) -> (i32, i32) {
    %c0_i32 = arith.constant 0 : i32
    %c0_i32_0 = arith.constant 0 : i32
    %c0_i32_1 = arith.constant 0 : i32
    return %c0_i32, %c0_i32_0 : i32, i32
  }
  func.func @transform_15(%arg0: i32) -> (i32, i32) {
    %c0_i32 = arith.constant 0 : i32
    %c0_i32_0 = arith.constant 0 : i32
    %c0_i32_1 = arith.constant 0 : i32
    return %c0_i32, %c0_i32_0 : i32, i32
  }
}

</mosaic_0001>

<bundles_post_ra>
// kernel: my_model_forward.1
= control target key start
LH: loop header
LB: loop body
LE: loop exit
PB: predicated region body
PF: predicated region fallthrough
CT: control target
= control target key end

     0   :  { %s4113_s0 = inlined_call_operand.vmem [shape: f32[8,128], index: 0, kind: input, shape index: {}]   ;;  %s4114_s1 = inlined_call_operand.vmem [shape: f32[1,8], index: 1, kind: input, shape index: {}]   ;;  %s4115_s2 = inlined_call_operand.vmem [shape: f32[2,128], index: 2, kind: input, shape index: {}]   ;;  %s4116_s3 = inlined_call_operand.hbm [shape: bf16[2,128,384], index: 3, kind: input, shape index: {}]   ;;  %s4117_s4 = inlined_call_operand.vmem [shape: f32[2,1,384], index: 4, kind: input, shape index: {}]   ;;  %s4118_s5 = inlined_call_operand.vmem [shape: bf16[2,128,128], index: 5, kind: input, shape index: {}]   ;;  %s4119_s6 = inlined_call_operand.vmem [shape: f32[2,1,128], index: 6, kind: input, shape index: {}]   ;;  %s4120_s7 = inlined_call_operand.vmem [shape: f32[2,2,128], index: 7, kind: input, shape index: {}]   ;;  %s4121_s8 = inlined_call_operand.hbm [shape: bf16[2,128,256], index: 8, kind: input, shape index: {}]   ;;  %s4122_s9 = inlined_call_operand.vmem [shape: f32[2,1,256], index: 9, kind: input, shape index: {}]   ;;  %s4123_s10 = inlined_call_operand.hbm [shape: bf16[2,256,128], index: 10, kind: input, shape index: {}]   ;;  %s4124_s11 = inlined_call_operand.vmem [shape: f32[2,1,128], index: 11, kind: input, shape index: {}]   ;;  %s4125_s12 = inlined_call_operand.vmem [shape: f32[2,2,128], index: 12, kind: input, shape index: {}]   ;;  %s4126_s13 = inlined_call_operand.vmem [shape: f32[1,128], index: 13, kind: input, shape index: {}]   ;;  %s4127_s14 = inlined_call_operand.<no memory space> [shape: f32[1,1], index: 14, kind: input, shape index: {}]   ;;  %s4128_s15 = inlined_call_operand.hbm [shape: f32[1,1], index: 15, kind: output, shape index: {}]  }
   0x1   :  { %v20_v0 = vstv %s4127_s14 }
   0x2   :  { %21 = vst [vmem:[#allocation2] sm:$0x1] %v20_v0 }
   0x3   :  { %22 = vsyncpa [#allocation4], 0 }
   0x4   :  { %23 = vsyncpa [#allocation7], 0 }
   0x5   :  { %24 = vsyncpa [#allocation5], 0  ;;  %s3626_s20 = smov [#allocation6]   ;;  %s3532_s24 = scalar_lea.hbm %s4121_s8, 4096 }
   0x6   :  { %s56_s21 = sshll.u32 %s3626_s20, 4  ;;  %p3533_p0 = scmp.ne.s32.totalorder %s4121_s8, %s3532_s24  ;;  %s57_s21 = int_to_ptr.vmem [resolvable:$true] %s56_s21 }
   0x7   :  { %p3536_p1 = scmp.lt.u32.totalorder %s3532_s24, %s4121_s8 }
   0x9   :  { %p3538_p2 = pnand %p3536_p1, %p3533_p0 }
   0xb   :  { %3541 = shalt.err (!%p3538_p2)
}
   0xc   :  { %s3542_s14 = scalar_lea.vmem %s57_s21, 4096  ;;  %p3547_p4 = scmp.lt.s32.totalorder %s57_s21, %s57_s21 }
   0xd   :  { %p3543_p3 = scmp.ne.s32.totalorder %s57_s21, %s3542_s14  ;;  %p3548_p5 = scmp.lt.s32.totalorder %s3542_s14, %s3542_s14 }
   0xf   :  { %p3549_p6 = por %p3548_p5, %p3547_p4 }
  0x11   :  { %p3550_p7 = pnand %p3549_p6, %p3543_p3 }
  0x13   :  { %3553 = shalt.err (!%p3550_p7)
}
  0x14   :  { %s3627_s29 = smov 128   ;;  %s3628_s30 = smov 8  }
  0x15   :  { %62 = dma.hbm_to_vmem [thread:$0]  %s4121_s8, 4096, %s57_s21, [#allocation7], %s3627_s29, %s3627_s29, %s3628_s30  }
  0x16   :  { %s3629_s18 = smov [#allocation3]   ;;  %s3554_s23 = scalar_lea.hbm %s4116_s3, 6144 }
  0x17   :  { %s36_s19 = sshll.u32 %s3629_s18, 4  ;;  %p3555_p8 = scmp.ne.s32.totalorder %s4116_s3, %s3554_s23  ;;  %s37_s19 = int_to_ptr.vmem [resolvable:$true] %s36_s19 }
  0x18   :  { %p3558_p9 = scmp.lt.u32.totalorder %s3554_s23, %s4116_s3 }
  0x1a   :  { %p3560_p10 = pnand %p3558_p9, %p3555_p8 }
  0x1c   :  { %3563 = shalt.err (!%p3560_p10)
}
  0x1d   :  { %s3564_s28 = scalar_lea.vmem %s37_s19, 6144  ;;  %p3569_p12 = scmp.lt.s32.totalorder %s37_s19, %s37_s19 }
  0x1e   :  { %p3565_p11 = scmp.ne.s32.totalorder %s37_s19, %s3564_s28  ;;  %p3570_p13 = scmp.lt.s32.totalorder %s3564_s28, %s3564_s28 }
  0x20   :  { %p3571_p0 = por %p3570_p13, %p3569_p12 }
  0x22   :  { %p3572_p1 = pnand %p3571_p0, %p3565_p11 }
  0x24   :  { %3575 = shalt.err (!%p3572_p1)
}
  0x25   :  { %s3630_s8 = smov 192   ;;  %s3631_s21 = smov 12  }
  0x26   :  { %42 = dma.hbm_to_vmem [thread:$0]  %s4116_s3, 6144, %s37_s19, [#allocation4], %s3630_s8, %s3630_s8, %s3631_s21  }
  0x27   :  { %s3632_s30 = smov [#allocation8]   ;;  %s3576_s20 = scalar_lea.hbm %s4123_s10, 4096 }
  0x28   :  { %s70_s16 = sshll.u32 %s3632_s30, 4  ;;  %p3577_p2 = scmp.ne.s32.totalorder %s4123_s10, %s3576_s20  ;;  %s71_s16 = int_to_ptr.vmem [resolvable:$true] %s70_s16 }
  0x29   :  { %p3580_p3 = scmp.lt.u32.totalorder %s3576_s20, %s4123_s10 }
  0x2b   :  { %p3582_p4 = pnand %p3580_p3, %p3577_p2 }
  0x2d   :  { %3585 = shalt.err (!%p3582_p4)
}
  0x2e   :  { %s3586_s26 = scalar_lea.vmem %s71_s16, 4096  ;;  %p3591_p6 = scmp.lt.s32.totalorder %s71_s16, %s71_s16 }
  0x2f   :  { %p3587_p5 = scmp.ne.s32.totalorder %s71_s16, %s3586_s26  ;;  %p3592_p7 = scmp.lt.s32.totalorder %s3586_s26, %s3586_s26 }
  0x31   :  { %p3593_p8 = por %p3592_p7, %p3591_p6 }
  0x33   :  { %p3594_p9 = pnand %p3593_p8, %p3587_p5 }
  0x35   :  { %3597 = shalt.err (!%p3594_p9)
}
  0x36   :  { %s3633_s3 = smov 64   ;;  %s3634_s19 = smov 4  }
  0x37   :  { %76 = dma.hbm_to_vmem [thread:$0]  %s4123_s10, 4096, %s71_s16, [#allocation7], %s3633_s3, %s3633_s3, %s3634_s19  }
  0x38   :  { %3620 = dma.done.wait [#allocation4], 6144  }
  0x39   :  { %3621 = vsyncadd [#allocation4], 4294961152 }
  0x3a   :  { %3622 = dma.done.wait [#allocation7], 8192  }
  0x3b   :  { %3623 = vsyncadd [#allocation7], 4294959104  ;;  %v95_v1 = vld [vmem:[%s4113_s0] sm:$0xff]  ;;  %v3635_v4 = vmov 0.0   ;;  %v3321_v5 = vld [vmem:[#allocation3 + $0x8] ss:$12 sps:$4 sm:$0xff]   ;;  %v109_v34 = vlaneseq }
  0x3c   :  { %97 = vadd.xlane.f32.xlu0 %v95_v1  ;;  %v3318_v2 = vld [vmem:[#allocation3 + $0x4] ss:$12 sps:$4 sm:$0xff]   ;;  %v3320_v3 = vld [vmem:[#allocation3] ss:$12 sps:$4 sm:$0xff]   ;;  %3135 = vmatprep.subr.bf16.mxu1 %v3635_v4  ;;  %v3322_v6 = vld [vmem:[#allocation3 + $0x1c] ss:$12 sps:$4 sm:$0xff]  }
  0x3d   :  { %v3324_v7 = vld [vmem:[#allocation3 + $0x18] ss:$12 sps:$4 sm:$0xff]   ;;  %298 = vmatprep.subr.bf16.mxu0 %v3318_v2  ;;  %v3325_v8 = vld [vmem:[#allocation3 + $0x20] ss:$12 sps:$4 sm:$0xff]   ;;  %3136 = vmatpush3.bf16.msra.mxu1 %v3321_v5  ;;  %v3328_v14 = vld [vmem:[#allocation3 + $0x30] ss:$12 sps:$4 sm:$0xff]  }
  0x3e   :  { %v3326_v9 = vld [vmem:[#allocation3 + $0x34] ss:$12 sps:$4 sm:$0xff]   ;;  %299 = vmatpush1.bf16.msra.mxu0 %v3320_v3  ;;  %3137 = vmatprep.subr.bf16.mxu1 %v3635_v4  ;;  %v3329_v15 = vld [vmem:[#allocation3 + $0x38] ss:$12 sps:$4 sm:$0xff]   ;;  %v3333_v18 = vld [vmem:[#allocation3 + $0x50] ss:$12 sps:$4 sm:$0xff]  }
  0x3f   :  { %300 = vmatprep.subr.bf16.mxu0 %v3322_v6  ;;  %v3330_v16 = vld [vmem:[#allocation3 + $0x4c] ss:$12 sps:$4 sm:$0xff]   ;;  %v3332_v17 = vld [vmem:[#allocation3 + $0x48] ss:$12 sps:$4 sm:$0xff]   ;;  %v3334_v19 = vld [vmem:[#allocation3 + $0x64] ss:$12 sps:$4 sm:$0xff]  }
  0x40   :  { %v3336_v20 = vld [vmem:[#allocation3 + $0x60] ss:$12 sps:$4 sm:$0xff]   ;;  %v3337_v21 = vld [vmem:[#allocation3 + $0x68] ss:$12 sps:$4 sm:$0xff]   ;;  %v3340_v23 = vld [vmem:[#allocation3 + $0x78] ss:$12 sps:$4 sm:$0xff]  }
  0x41   :  { %3138 = vmatpush3.bf16.msra.mxu1 %v3325_v8  ;;  %v3338_v22 = vld [vmem:[#allocation3 + $0x7c] ss:$12 sps:$4 sm:$0xff]   ;;  %v3341_v24 = vld [vmem:[#allocation3 + $0x80] ss:$12 sps:$4 sm:$0xff]   ;;  %v3636_v26 = vmov 0   ;;  %vm3637_vm0 = vmmov 0  }
  0x42   :  { %301 = vmatpush1.bf16.msra.mxu0 %v3324_v7  ;;  %3139 = vmatprep.subr.bf16.mxu1 %v3635_v4  ;;  %v3342_v25 = vld [vmem:[#allocation3 + $0x94] ss:$12 sps:$4 sm:$0xff]   ;;  %v3344_v27 = vld [vmem:[#allocation3 + $0x90] ss:$12 sps:$4 sm:$0xff]   ;;  %v3345_v28 = vld [vmem:[#allocation3 + $0x98] ss:$12 sps:$4 sm:$0xff]  }
  0x43   :  { %302 = vmatprep.subr.bf16.mxu0 %v3326_v9  ;;  %330 = vmatprep.mubr.bf16.mxu0 %v3636_v26  ;;  %v3346_v29 = vld [vmem:[#allocation3 + $0xac] ss:$12 sps:$4 sm:$0xff]   ;;  %v3348_v30 = vld [vmem:[#allocation3 + $0xa8] ss:$12 sps:$4 sm:$0xff]   ;;  %v3349_v31 = vld [vmem:[#allocation3 + $0xb0] ss:$12 sps:$4 sm:$0xff]  }
  0x44   :  { %3151 = vmatprep.mubr.msk.bf16.mxu1 %vm3637_vm0, %v3635_v4  ;;  %v3778_v36 = vshrl.u32 %v109_v34, 7  ;;  %v96_v38 = vld [vmem:[%s4115_s2] sm:$0x3]  ;;  %vm379_vm1 = vcmask 261120   ;;  %s3638_s29 = smov 96   ;;  %s3639_s30 = smov 32  }
  0x45   :  { %3140 = vmatpush3.bf16.msra.mxu1 %v3329_v15  ;;  %v153_v47 = vld [vmem:[%s4117_s4] sm:$0x7]  ;;  %vm754_vm2 = vcmask 1043456   ;;  %vm704_vm3 = vcmask 64512   ;;  %vm959_vm4 = vcmask 523264   ;;  %vm961_vm5 = vcmask 785408  }
  0x46   :  { %303 = vmatpush1.bf16.msra.mxu0 %v3328_v14  ;;  %3141 = vmatprep.subr.bf16.mxu1 %v3635_v4  ;;  %v3781_v37 = vsub.s32 0, %v3778_v36  ;;  %v3787_v39 = vsub.s32 1, %v3778_v36  ;;  %v165_v61 = vsub.s32 2, %v3778_v36  ;;  %v3841_v9 = vld [vmem:[%s4114_s1] ss:$0 sm:$0xff]  ;;  %vm2813_vm6 = vcmask 1040384  }
  0x47   :  { %304 = vmatprep.subr.bf16.mxu0 %v3330_v16  ;;  %vm2825_vm7 = vcmask 0  }
  0x48   :  { %v112_v40 = vrot.slane %v96_v38, %v3781_v37  ;;  %v117_v43 = vrot.slane %v96_v38, %v3787_v39  ;;  %v158_v48 = vrot.slane %v153_v47, %v3781_v37  ;;  %v162_v49 = vrot.slane %v153_v47, %v3787_v39 }
  0x49   :  { %3142 = vmatpush3.bf16.msra.mxu1 %v3333_v18  ;;  %v166_v0 = vrot.slane %v153_v47, %v165_v61 }
  0x4a   :  { %305 = vmatpush1.bf16.msra.mxu0 %v3332_v17  ;;  %3143 = vmatprep.subr.bf16.mxu1 %v3635_v4 }
  0x4b   :  { %306 = vmatprep.subr.bf16.mxu0 %v3334_v19 }
  0x4d   :  { %3144 = vmatpush3.bf16.msra.mxu1 %v3337_v21 }
  0x4e   :  { %307 = vmatpush1.bf16.msra.mxu0 %v3336_v20  ;;  %3145 = vmatprep.subr.bf16.mxu1 %v3635_v4 }
  0x4f   :  { %308 = vmatprep.subr.bf16.mxu0 %v3338_v22 }
  0x51   :  { %3146 = vmatpush3.bf16.msra.mxu1 %v3341_v24 }
  0x52   :  { %309 = vmatpush1.bf16.msra.mxu0 %v3340_v23  ;;  %3147 = vmatprep.subr.bf16.mxu1 %v3635_v4 }
  0x53   :  { %310 = vmatprep.subr.bf16.mxu0 %v3342_v25 }
  0x55   :  { %3148 = vmatpush3.bf16.msra.mxu1 %v3345_v28 }
  0x56   :  { %311 = vmatpush1.bf16.msra.mxu0 %v3344_v27  ;;  %3149 = vmatprep.subr.bf16.mxu1 %v3635_v4 }
  0x57   :  { %312 = vmatprep.subr.bf16.mxu0 %v3346_v29 }
  0x59   :  { %3150 = vmatpush3.bf16.msra.mxu1 %v3349_v31 }
  0x5a   :  { %313 = vmatpush1.bf16.msra.mxu0 %v3348_v30  ;;  %3160 = vmatprep.subr.mxu1 %v3635_v4 }
  0x5b   :  { %3155 = vmatprep.subr.mxu0 %v3635_v4 }
  0xc9   :  { %v98_v10 = vpop.xlane.xlu0 %97 }
  0xca   :  { %v100_v11 = vmul.f32 0.0078125, %v98_v10 }
  0xcc   :  { %v101_v12 = vsub.f32 %v95_v1, %v100_v11 }
  0xce   :  { %v102_v13 = vmul.f32 %v101_v12, %v101_v12 }
  0xd0   :  { %103 = vadd.xlane.f32.xlu0 %v102_v13 }
 0x15d   :  { %v104_v32 = vpop.xlane.xlu0 %103 }
 0x15e   :  { %v105_v33 = vmul.f32 0.0078125, %v104_v32 }
 0x160   :  { %v106_v35 = vadd.f32 1e-12, %v105_v33 }
 0x162   :  { %3478 = vrsqrt.f32 %v106_v35 }
 0x16c   :  { %v3479_v41 = vpop.eup %3478 }
 0x16d   :  { %v108_v42 = vmul.f32 %v3479_v41, %v101_v12 }
 0x16f   :  { %v113_v44 = vmul.f32 %v112_v40, %v108_v42 }
 0x171   :  { %v3791_v45 = vadd.f32 %v117_v43, %v113_v44 }
 0x173   :  { %v120_v46 = vpack.c.bf16 %v3791_v45, %v3791_v45 }
 0x175   :  { %331 = vmatmul.mubr.bf16.vlgmr.msra.gmra.mrb[0].mxu0 %v120_v46  ;;  %3152 = vmatmul.mubr.bf16.vlgmr.msra.gmra.mrb[0].mxu1 %v120_v46 }
 0x176   :  { %3157 = vmatprep.mubr.msk.f32.mxu0 %vm3637_vm0, %v3635_v4  ;;  %3162 = vmatprep.mubr.msk.f32.mxu1 %vm3637_vm0, %v3635_v4 }
 0x248   :  { %v332_v50 = vpop.f32.mrb[0].mxu0  ;;  %v373_v51 = vpop.f32.mrb[0].mxu1 }
 0x249   :  { %v333_v52 = vadd.f32 %v332_v50, %v158_v48  ;;  %v334_v53 = vpop.f32.mrb[1].mxu0  ;;  %v3153_v54 = vpop.f32.mrb[1].mxu1  ;;  %v374_v2 = vadd.f32 %v373_v51, %v166_v0 }
 0x24a   :  { %v335_v55 = vadd.f32 %v334_v53, %v162_v49  ;;  %v336_v56 = vpop.f32.mrb[2].mxu0  ;;  %v376_v57 = vpop.f32.mrb[2].mxu1 }
 0x24b   :  { %v337_v58 = vpop.f32.mrb[3].mxu0  ;;  %v3154_v59 = vpop.f32.mrb[3].mxu1  ;;  %456 = vrot.lane.b32.xlu1 %v333_v52, %s3638_s29  ;;  %v3828_v5 = vpack.c.bf16 %v374_v2, %v374_v2 }
 0x24c   :  { %536 = vrot.lane.b32.xlu0 %v335_v55, %s3633_s3  ;;  %3156 = vmatpush3.xpose.msk.msra.mxu0 %vm379_vm1, %v335_v55 }
 0x24d   :  { %3165 = vmatprep.subr.mxu0 %v3635_v4  ;;  %v756_v7 = vsel %vm754_vm2, %v3828_v5, 0 }
 0x24f   :  { %458 = vrot.lane.b32.xlu1 %v335_v55, %s3638_s29  ;;  %3158 = vmatmul.mubr.msk.f32.vlgmr.msra.gmra.mrb[4].mxu0 %vm379_vm1, %v333_v52 }
 0x250   :  { %3167 = vmatprep.mubr.msk.f32.mxu0 %vm3637_vm0, %v3635_v4 }
 0x253   :  { %534 = vrot.lane.b32.xlu1 %v333_v52, %s3633_s3 }
 0x257   :  { %614 = vrot.lane.b32.xlu1 %v335_v55, %s3639_s30 }
 0x25b   :  { %612 = vrot.lane.b32.xlu1 %v333_v52, %s3639_s30 }
 0x2bd   :  { %v457_v60 = vpop.permute.xlu1 %456 }
 0x2be   :  { %v537_v62 = vpop.permute.xlu0 %536 }
 0x2bf   :  { %3166 = vmatpush3.xpose.msk.msra.mxu0 %vm379_vm1, %v537_v62 }
 0x2c0   :  { %3187 = vmatprep.subr.bf16.mxu0 %v3635_v4 }
 0x2c1   :  { %v459_v63 = vpop.permute.xlu1 %458 }
 0x2c2   :  { %3161 = vmatpush3.xpose.msk.msra.mxu1 %vm379_vm1, %v459_v63 }
 0x2c3   :  { %3170 = vmatprep.subr.mxu1 %v3635_v4 }
 0x2c5   :  { %3163 = vmatmul.mubr.msk.f32.vlgmr.msra.gmra.mrb[4].mxu1 %vm379_vm1, %v457_v60  ;;  %v535_v1 = vpop.permute.xlu1 %534 }
 0x2c6   :  { %3168 = vmatmul.mubr.msk.f32.vlgmr.msra.gmra.mrb[6].mxu0 %vm379_vm1, %v535_v1  ;;  %3172 = vmatprep.mubr.msk.f32.mxu1 %vm3637_vm0, %v3635_v4 }
 0x2c7   :  { %3189 = vmatprep.mubr.msk.bf16.mxu0 %vm3637_vm0, %v3635_v4 }
 0x2c9   :  { %v615_v3 = vpop.permute.xlu1 %614 }
 0x2ca   :  { %3171 = vmatpush3.xpose.msk.msra.mxu1 %vm379_vm1, %v615_v3 }
 0x2cb   :  { %3175 = vmatprep.subr.bf16.mxu1 %v3635_v4 }
 0x2cd   :  { %v613_v6 = vpop.permute.xlu1 %612 }
 0x2ce   :  { %3173 = vmatmul.mubr.msk.f32.vlgmr.msra.gmra.mrb[6].mxu1 %vm379_vm1, %v613_v6 }
 0x2cf   :  { %3176 = vmatpush3.bf16.msra.mxu1 %v756_v7  ;;  %3177 = vmatprep.mubr.msk.bf16.mxu1 %vm3637_vm0, %v3635_v4 }
 0x2d0   :  { %3181 = vmatprep.subr.bf16.mxu1 %v3635_v4 }
 0x322   :  { %v452_v8 = vpop.f32.mrb[4].mxu0 }
 0x323   :  { %v690_v10 = vmul.f32 0.17677669, %v452_v8  ;;  %v3159_v11 = vpop.f32.mrb[5].mxu0 }
 0x325   :  { %v700_v12 = vadd.f32 %v3841_v9, %v690_v10 }
 0x327   :  { %v705_v13 = vsel %vm704_vm3, %v700_v12, -inf }
 0x328   :  { %706 = vmax.xlane.f32.xlu1 %v705_v13 }
 0x398   :  { %v530_v14 = vpop.f32.mrb[4].mxu1 }
 0x399   :  { %v691_v15 = vmul.f32 0.17677669, %v530_v14  ;;  %v3164_v16 = vpop.f32.mrb[5].mxu1  ;;  %v608_v17 = vpop.f32.mrb[6].mxu0 }
 0x39a   :  { %v692_v18 = vmul.f32 0.17677669, %v608_v17  ;;  %v3169_v19 = vpop.f32.mrb[7].mxu0 }
 0x39b   :  { %v701_v20 = vadd.f32 %v3841_v9, %v691_v15  ;;  %v3350_v19 = vld [vmem:[%s4118_s5] sm:$0xff]  }
 0x39c   :  { %v702_v21 = vadd.f32 %v3841_v9, %v692_v18 }
 0x39d   :  { %v708_v22 = vsel %vm704_vm3, %v701_v20, -inf }
 0x39e   :  { %709 = vmax.xlane.f32.xlu0 %v708_v22  ;;  %v711_v23 = vsel %vm704_vm3, %v702_v21, -inf  ;;  %v3353_v22 = vld [vmem:[%s4118_s5 + $0x18] sm:$0xff]  }
 0x39f   :  { %712 = vmax.xlane.f32.xlu1 %v711_v23 }
 0x3a1   :  { %v686_v24 = vpop.f32.mrb[6].mxu1 }
 0x3a2   :  { %v693_v25 = vmul.f32 0.17677669, %v686_v24  ;;  %v3174_v27 = vpop.f32.mrb[7].mxu1 }
 0x3a4   :  { %v703_v28 = vadd.f32 %v3841_v9, %v693_v25 }
 0x3a6   :  { %v714_v29 = vsel %vm704_vm3, %v703_v28, -inf }
 0x3a7   :  { %715 = vmax.xlane.f32.xlu1 %v714_v29 }
 0x3b5   :  { %v707_v30 = vpop.xlane.xlu1 %706 }
 0x3b6   :  { %v717_v31 = vsub.f32 %v700_v12, %v707_v30 }
 0x3b8   :  { %v721_v32 = vmul.f32 1.442695, %v717_v31  ;;  %v3354_v31 = vld [vmem:[%s4118_s5 + $0x20] sm:$0xff]  }
 0x3ba   :  { %3480 = vpow2.f32 %v721_v32 }
 0x3c4   :  { %v3481_v33 = vpop.eup %3480 }
 0x3c5   :  { %v729_v34 = vsel %vm704_vm3, %v3481_v33, 0.0 }
 0x3c6   :  { %730 = vadd.xlane.f32.xlu0 %v729_v34  ;;  %v3356_v34 = vld [vmem:[%s4118_s5 + $0x30] sm:$0xff]  }
 0x42b   :  { %v710_v35 = vpop.xlane.xlu0 %709 }
 0x42c   :  { %v718_v38 = vsub.f32 %v701_v20, %v710_v35  ;;  %v713_v40 = vpop.xlane.xlu1 %712  ;;  %v3351_v20 = vld [vmem:[%s4118_s5 + $0x8] sm:$0xff]   ;;  %v3357_v35 = vld [vmem:[%s4118_s5 + $0x38] sm:$0xff]  }
 0x42d   :  { %v719_v41 = vsub.f32 %v702_v21, %v713_v40  ;;  %v3352_v21 = vld [vmem:[%s4118_s5 + $0x10] sm:$0xff]  }
 0x42e   :  { %v723_v42 = vmul.f32 1.442695, %v718_v38 }
 0x42f   :  { %v725_v43 = vmul.f32 1.442695, %v719_v41 }
 0x430   :  { %3482 = vpow2.f32 %v723_v42 }
 0x431   :  { %3484 = vpow2.f32 %v725_v43 }
 0x434   :  { %v716_v50 = vpop.xlane.xlu1 %715 }
 0x435   :  { %v720_v51 = vsub.f32 %v703_v28, %v716_v50 }
 0x437   :  { %v727_v53 = vmul.f32 1.442695, %v720_v51  ;;  %v2880_v51 = vld [vmem:[%s4119_s6] ss:$0 sm:$0xff] }
 0x43a   :  { %v3483_v44 = vpop.eup %3482 }
 0x43b   :  { %v3485_v46 = vpop.eup %3484  ;;  %v732_v47 = vsel %vm704_vm3, %v3483_v44, 0.0 }
 0x43c   :  { %733 = vadd.xlane.f32.xlu1 %v732_v47  ;;  %v735_v48 = vsel %vm704_vm3, %v3485_v46, 0.0 }
 0x43d   :  { %736 = vadd.xlane.f32.xlu0 %v735_v48 }
 0x44d   :  { %849 = vrot.lane.b32.xlu1 %v3828_v5, %s3633_s3 }
 0x453   :  { %v731_v49 = vpop.xlane.xlu0 %730  ;;  %800 = vrot.lane.b32.xlu0 %v3828_v5, %s3638_s29 }
 0x454   :  { %3486 = vrcp.f32 %v731_v49 }
 0x455   :  { %3488 = vpow2.f32 %v727_v53 }
 0x45e   :  { %v3487_v52 = vpop.eup %3486 }
 0x45f   :  { %v745_v54 = vmul.f32 %v3487_v52, %v3481_v33  ;;  %v3489_v56 = vpop.eup %3488  ;;  %v3355_v33 = vld [vmem:[%s4118_s5 + $0x28] sm:$0xff]  }
 0x460   :  { %v738_v57 = vsel %vm704_vm3, %v3489_v56, 0.0 }
 0x461   :  { %v749_v55 = vpack.c.bf16 %v745_v54, %v745_v54 }
 0x463   :  { %3178 = vmatmul.mubr.msk.bf16.vlgmr.msra.gmra.mrb[8].mxu1 %vm704_vm3, %v749_v55 }
 0x464   :  { %3183 = vmatprep.mubr.msk.bf16.mxu1 %vm3637_vm0, %v3635_v4 }
 0x471   :  { %739 = vadd.xlane.f32.xlu1 %v738_v57 }
 0x482   :  { %898 = vrot.lane.b32.xlu1 %v3828_v5, %s3639_s30 }
 0x4c9   :  { %v734_v58 = vpop.xlane.xlu1 %733 }
 0x4ca   :  { %3490 = vrcp.f32 %v734_v58  ;;  %v737_v59 = vpop.xlane.xlu0 %736  ;;  %v3358_v58 = vld [vmem:[#allocation6] ss:$8 sps:$4 sm:$0xff]  }
 0x4cb   :  { %3492 = vrcp.f32 %v737_v59  ;;  %v3360_v59 = vld [vmem:[#allocation6 + $0x4] ss:$8 sps:$4 sm:$0xff]  }
 0x4cd   :  { %v850_v60 = vpop.permute.xlu1 %849 }
 0x4ce   :  { %v855_v62 = vsel %vm754_vm2, %v850_v60, 0  ;;  %v801_v63 = vpop.permute.xlu0 %800  ;;  %v3363_v60 = vld [vmem:[#allocation6 + $0x14] ss:$8 sps:$4 sm:$0xff]  }
 0x4cf   :  { %v806_v0 = vsel %vm754_vm2, %v801_v63, 0  ;;  %3188 = vmatpush3.bf16.msra.mxu0 %v855_v62  ;;  %v3361_v62 = vld [vmem:[#allocation6 + $0x10] ss:$8 sps:$4 sm:$0xff]   ;;  %v3366_v63 = vld [vmem:[#allocation6 + $0x24] ss:$8 sps:$4 sm:$0xff]  }
 0x4d0   :  { %3182 = vmatpush3.bf16.msra.mxu1 %v806_v0  ;;  %3199 = vmatprep.subr.bf16.mxu0 %v3635_v4  ;;  %v3364_v0 = vld [vmem:[#allocation6 + $0x20] ss:$8 sps:$4 sm:$0xff]  }
 0x4d1   :  { %3193 = vmatprep.subr.bf16.mxu1 %v3635_v4 }
 0x4d4   :  { %v3491_v1 = vpop.eup %3490 }
 0x4d5   :  { %v3493_v2 = vpop.eup %3492  ;;  %v746_v3 = vmul.f32 %v3491_v1, %v3483_v44 }
 0x4d6   :  { %v747_v5 = vmul.f32 %v3493_v2, %v3485_v46 }
 0x4d7   :  { %v798_v6 = vpack.c.bf16 %v746_v3, %v746_v3 }
 0x4d8   :  { %v848_v7 = vpack.c.bf16 %v747_v5, %v747_v5 }
 0x4d9   :  { %3184 = vmatmul.mubr.msk.bf16.vlgmr.msra.gmra.mrb[12].mxu1 %vm704_vm3, %v798_v6  ;;  %v3369_v6 = vld [vmem:[#allocation6 + $0x34] ss:$8 sps:$4 sm:$0xff]  }
 0x4da   :  { %3190 = vmatmul.mubr.msk.bf16.vlgmr.msra.gmra.mrb[8].mxu0 %vm704_vm3, %v848_v7  ;;  %3195 = vmatprep.mubr.msk.bf16.mxu1 %vm3637_vm0, %v3635_v4  ;;  %v3372_v7 = vld [vmem:[#allocation6 + $0x44] ss:$8 sps:$4 sm:$0xff]  }
 0x4db   :  { %3215 = vmatprep.mubr.msk.bf16.mxu0 %vm3637_vm0, %v3635_v4  ;;  %3200 = vmatpush3.bf16.msra.mxu0 %v3350_v19  ;;  %v1076_v19 = vld [vmem:[%s4120_s7] sm:$0x3] }
 0x4dc   :  { %3201 = vmatprep.subr.bf16.mxu0 %v3635_v4 }
 0x4df   :  { %3202 = vmatpush3.bf16.msra.mxu0 %v3351_v20  ;;  %v1091_v20 = vrot.slane %v1076_v19, %v3781_v37 }
 0x4e0   :  { %3203 = vmatprep.subr.bf16.mxu0 %v3635_v4 }
 0x4e3   :  { %3204 = vmatpush3.bf16.msra.mxu0 %v3352_v21 }
 0x4e4   :  { %3205 = vmatprep.subr.bf16.mxu0 %v3635_v4 }
 0x4e7   :  { %3206 = vmatpush3.bf16.msra.mxu0 %v3353_v22 }
 0x4e8   :  { %3207 = vmatprep.subr.bf16.mxu0 %v3635_v4 }
 0x4eb   :  { %3208 = vmatpush3.bf16.msra.mxu0 %v3354_v31  ;;  %v3385_v31 = vld [vmem:[#allocation8 + $0x8] sm:$0xff]  }
 0x4ec   :  { %3209 = vmatprep.subr.bf16.mxu0 %v3635_v4 }
 0x4ef   :  { %3210 = vmatpush3.bf16.msra.mxu0 %v3355_v33  ;;  %v3387_v33 = vld [vmem:[#allocation8 + $0x10] sm:$0xff]  }
 0x4f0   :  { %3211 = vmatprep.subr.bf16.mxu0 %v3635_v4 }
 0x4f3   :  { %3212 = vmatpush3.bf16.msra.mxu0 %v3356_v34  ;;  %v3388_v34 = vld [vmem:[#allocation8 + $0x58] sm:$0xff]  }
 0x4f4   :  { %3213 = vmatprep.subr.bf16.mxu0 %v3635_v4 }
 0x4f7   :  { %3214 = vmatpush3.bf16.msra.mxu0 %v3357_v35  ;;  %v3389_v35 = vld [vmem:[#allocation8 + $0x18] sm:$0xff]  }
 0x4fe   :  { %v740_v8 = vpop.xlane.xlu1 %739 }
 0x4ff   :  { %3494 = vrcp.f32 %v740_v8  ;;  %v3370_v8 = vld [vmem:[#allocation6 + $0x40] ss:$8 sps:$4 sm:$0xff]  }
 0x502   :  { %v899_v10 = vpop.permute.xlu1 %898 }
 0x503   :  { %v904_v11 = vsel %vm754_vm2, %v899_v10, 0  ;;  %v3375_v10 = vld [vmem:[#allocation6 + $0x54] ss:$8 sps:$4 sm:$0xff]  }
 0x504   :  { %3194 = vmatpush3.bf16.msra.mxu1 %v904_v11  ;;  %v3373_v11 = vld [vmem:[#allocation6 + $0x50] ss:$8 sps:$4 sm:$0xff]  }
 0x505   :  { %1207 = vmatprep.subr.bf16.mxu1 %v3360_v59 }
 0x509   :  { %v3495_v12 = vpop.eup %3494 }
 0x50a   :  { %v748_v13 = vmul.f32 %v3495_v12, %v3489_v56  ;;  %v3378_v12 = vld [vmem:[#allocation6 + $0x64] ss:$8 sps:$4 sm:$0xff]  }
 0x50c   :  { %v897_v14 = vpack.c.bf16 %v748_v13, %v748_v13  ;;  %v3376_v13 = vld [vmem:[#allocation6 + $0x60] ss:$8 sps:$4 sm:$0xff]  }
 0x50e   :  { %3196 = vmatmul.mubr.msk.bf16.vlgmr.msra.gmra.mrb[16].mxu1 %vm704_vm3, %v897_v14  ;;  %v3381_v14 = vld [vmem:[#allocation6 + $0x74] ss:$8 sps:$4 sm:$0xff]  }
 0x50f   :  { %1239 = vmatprep.mubr.bf16.mxu1 %v3636_v26  ;;  %1208 = vmatpush1.bf16.msra.mxu1 %v3358_v58 }
 0x510   :  { %1209 = vmatprep.subr.bf16.mxu1 %v3363_v60 }
 0x513   :  { %1210 = vmatpush1.bf16.msra.mxu1 %v3361_v62 }
 0x514   :  { %1211 = vmatprep.subr.bf16.mxu1 %v3366_v63 }
 0x517   :  { %1212 = vmatpush1.bf16.msra.mxu1 %v3364_v0 }
 0x518   :  { %1213 = vmatprep.subr.bf16.mxu1 %v3369_v6 }
 0x536   :  { %v792_v15 = vpop.f32.mrb[8].mxu1 }
 0x537   :  { %v3179_v16 = vpop.f32.mrb[9].mxu1 }
 0x538   :  { %v795_v17 = vpop.f32.mrb[10].mxu1 }
 0x539   :  { %v3180_v18 = vpop.f32.mrb[11].mxu1 }
 0x5ac   :  { %v842_v23 = vpop.f32.mrb[12].mxu1 }
 0x5ad   :  { %947 = vrot.lane.b32.xlu0 %v842_v23, %s3639_s30  ;;  %v3185_v24 = vpop.f32.mrb[13].mxu1  ;;  %v891_v25 = vpop.f32.mrb[8].mxu0  ;;  %v1096_v23 = vrot.slane %v1076_v19, %v3787_v39 }
 0x5ae   :  { %v845_v27 = vpop.f32.mrb[14].mxu1  ;;  %951 = vrot.lane.b32.xlu1 %v891_v25, %s3633_s3  ;;  %v3191_v28 = vpop.f32.mrb[9].mxu0 }
 0x5af   :  { %v3186_v29 = vpop.f32.mrb[15].mxu1  ;;  %v894_v30 = vpop.f32.mrb[10].mxu0  ;;  %v3382_v28 = vld [vmem:[#allocation8 + $0x40] sm:$0xff]  }
 0x5b0   :  { %v3192_v32 = vpop.f32.mrb[11].mxu0  ;;  %v3383_v29 = vld [vmem:[#allocation8] sm:$0xff]   ;;  %3057 = vmatprep.subr.bf16.mxu0 %v3382_v28  ;;  %v3384_v30 = vld [vmem:[#allocation8 + $0x48] sm:$0xff]  }
 0x5b1   :  { %v3386_v32 = vld [vmem:[#allocation8 + $0x50] sm:$0xff]   ;;  %v3404_v28 = vld [vmem:[#allocation3 + $0xdc] ss:$12 sps:$4 sm:$0xff]  }
 0x5e1   :  { %v940_v38 = vpop.f32.mrb[16].mxu1 }
 0x5e2   :  { %955 = vrot.lane.b32.xlu0 %v940_v38, %s3638_s29  ;;  %v3197_v40 = vpop.f32.mrb[17].mxu1  ;;  %v3390_v38 = vld [vmem:[#allocation8 + $0x60] sm:$0xff]  }
 0x5e3   :  { %v943_v41 = vpop.f32.mrb[18].mxu1  ;;  %v3391_v40 = vld [vmem:[#allocation8 + $0x20] sm:$0xff]  }
 0x5e4   :  { %v3198_v42 = vpop.f32.mrb[19].mxu1  ;;  %v3392_v41 = vld [vmem:[#allocation8 + $0x68] sm:$0xff]  }
 0x5e5   :  { %v3393_v42 = vld [vmem:[#allocation8 + $0x28] sm:$0xff]  }
 0x61f   :  { %v948_v43 = vpop.permute.xlu0 %947 }
 0x620   :  { %v958_v44 = vsel %vm379_vm1, %v792_v15, %v948_v43  ;;  %v952_v46 = vpop.permute.xlu1 %951  ;;  %v3379_v15 = vld [vmem:[#allocation6 + $0x70] ss:$8 sps:$4 sm:$0xff]  }
 0x621   :  { %v960_v47 = vsel %vm959_vm4, %v958_v44, %v952_v46  ;;  %v3394_v43 = vld [vmem:[#allocation8 + $0x70] sm:$0xff]   ;;  %v3396_v46 = vld [vmem:[#allocation8 + $0x78] sm:$0xff]  }
 0x622   :  { %v3395_v44 = vld [vmem:[#allocation8 + $0x30] sm:$0xff]  }
 0x654   :  { %v956_v48 = vpop.permute.xlu0 %955 }
 0x655   :  { %v962_v49 = vsel %vm961_vm5, %v960_v47, %v956_v48  ;;  %v3397_v47 = vld [vmem:[#allocation8 + $0x38] sm:$0xff]  }
 0x656   :  { %v963_v50 = vpack.c.bf16 %v962_v49, %v962_v49  ;;  %v1115_v48 = vld [vmem:[%s4122_s9] sm:$0x3] }
 0x657   :  { %v1120_v49 = vrot.slane %v1115_v48, %v3781_v37 }
 0x658   :  { %3216 = vmatmul.mubr.bf16.vlgmr.msra.gmra.mrb[12].mxu0 %v963_v50  ;;  %v1124_v50 = vrot.slane %v1115_v48, %v3787_v39  ;;  %v3418_v48 = vld [vmem:[#allocation3 + $0x138] ss:$12 sps:$4 sm:$0xff]  }
 0x659   :  { %3058 = vmatpush3.bf16.msra.mxu0 %v3383_v29  ;;  %v3405_v29 = vld [vmem:[#allocation3 + $0xe0] ss:$12 sps:$4 sm:$0xff]  }
 0x65a   :  { %3059 = vmatprep.subr.bf16.mxu0 %v3384_v30  ;;  %v3402_v30 = vld [vmem:[#allocation3 + $0xd8] ss:$12 sps:$4 sm:$0xff]  }
 0x65d   :  { %3060 = vmatpush3.bf16.msra.mxu0 %v3385_v31  ;;  %v3408_v31 = vld [vmem:[#allocation3 + $0xf4] ss:$12 sps:$4 sm:$0xff]  }
 0x65e   :  { %3061 = vmatprep.subr.bf16.mxu0 %v3386_v32  ;;  %v3406_v32 = vld [vmem:[#allocation3 + $0xf0] ss:$12 sps:$4 sm:$0xff]  }
 0x661   :  { %3062 = vmatpush3.bf16.msra.mxu0 %v3387_v33 }
 0x662   :  { %3063 = vmatprep.subr.bf16.mxu0 %v3388_v34 }
 0x665   :  { %3064 = vmatpush3.bf16.msra.mxu0 %v3389_v35 }
 0x666   :  { %3065 = vmatprep.subr.bf16.mxu0 %v3390_v38  ;;  %v3409_v38 = vld [vmem:[#allocation3 + $0xf8] ss:$12 sps:$4 sm:$0xff]  }
 0x669   :  { %3066 = vmatpush3.bf16.msra.mxu0 %v3391_v40  ;;  %v3412_v40 = vld [vmem:[#allocation3 + $0x10c] ss:$12 sps:$4 sm:$0xff]  }
 0x66a   :  { %3067 = vmatprep.subr.bf16.mxu0 %v3392_v41  ;;  %v3410_v41 = vld [vmem:[#allocation3 + $0x108] ss:$12 sps:$4 sm:$0xff]  }
 0x66d   :  { %3068 = vmatpush3.bf16.msra.mxu0 %v3393_v42  ;;  %v3413_v42 = vld [vmem:[#allocation3 + $0x110] ss:$12 sps:$4 sm:$0xff]  }
 0x66e   :  { %3069 = vmatprep.subr.bf16.mxu0 %v3394_v43  ;;  %v3416_v43 = vld [vmem:[#allocation3 + $0x124] ss:$12 sps:$4 sm:$0xff]  }
 0x671   :  { %3070 = vmatpush3.bf16.msra.mxu0 %v3395_v44  ;;  %v3414_v44 = vld [vmem:[#allocation3 + $0x120] ss:$12 sps:$4 sm:$0xff]  }
 0x672   :  { %3071 = vmatprep.subr.bf16.mxu0 %v3396_v46  ;;  %v3417_v46 = vld [vmem:[#allocation3 + $0x128] ss:$12 sps:$4 sm:$0xff]  }
 0x675   :  { %3072 = vmatpush3.bf16.msra.mxu0 %v3397_v47  ;;  %v3420_v47 = vld [vmem:[#allocation3 + $0x13c] ss:$12 sps:$4 sm:$0xff]  }
 0x676   :  { %3219 = vmatprep.subr.bf16.mxu0 %v3635_v4 }
 0x72b   :  { %v1069_v52 = vpop.f32.mrb[12].mxu0 }
 0x72c   :  { %v1070_v53 = vadd.f32 %v2880_v51, %v1069_v52  ;;  %v3217_v54 = vpop.f32.mrb[13].mxu0 }
 0x72d   :  { %v1072_v55 = vpop.f32.mrb[14].mxu0 }
 0x72e   :  { %v3218_v56 = vpop.f32.mrb[15].mxu0  ;;  %v1075_v57 = vadd.f32 %v1070_v53, %v3791_v45  ;;  %v3367_v45 = vld [vmem:[#allocation6 + $0x30] ss:$8 sps:$4 sm:$0xff]  }
 0x72f   :  { %1214 = vmatpush1.bf16.msra.mxu1 %v3367_v45 }
 0x730   :  { %1077 = vadd.xlane.f32.xlu1 %v1075_v57  ;;  %1215 = vmatprep.subr.bf16.mxu1 %v3372_v7 }
 0x733   :  { %1216 = vmatpush1.bf16.msra.mxu1 %v3370_v8 }
 0x734   :  { %1217 = vmatprep.subr.bf16.mxu1 %v3375_v10 }
 0x737   :  { %1218 = vmatpush1.bf16.msra.mxu1 %v3373_v11 }
 0x738   :  { %1219 = vmatprep.subr.bf16.mxu1 %v3378_v12 }
 0x73b   :  { %1220 = vmatpush1.bf16.msra.mxu1 %v3376_v13 }
 0x73c   :  { %1221 = vmatprep.subr.bf16.mxu1 %v3381_v14 }
 0x73f   :  { %1222 = vmatpush1.bf16.msra.mxu1 %v3379_v15 }
 0x7bd   :  { %v1078_v1 = vpop.xlane.xlu1 %1077 }
 0x7be   :  { %v1079_v2 = vmul.f32 0.0078125, %v1078_v1 }
 0x7c0   :  { %v1080_v3 = vsub.f32 %v1075_v57, %v1079_v2 }
 0x7c2   :  { %v1081_v5 = vmul.f32 %v1080_v3, %v1080_v3 }
 0x7c4   :  { %1082 = vadd.xlane.f32.xlu0 %v1081_v5 }
 0x851   :  { %v1083_v16 = vpop.xlane.xlu0 %1082 }
 0x852   :  { %v1084_v17 = vmul.f32 0.0078125, %v1083_v16  ;;  %v2905_v16 = vld [vmem:[%s4124_s11] ss:$0 sm:$0xff] }
 0x854   :  { %v1085_v18 = vadd.f32 1e-12, %v1084_v17 }
 0x856   :  { %3496 = vrsqrt.f32 %v1085_v18 }
 0x860   :  { %v3497_v21 = vpop.eup %3496 }
 0x861   :  { %v1087_v22 = vmul.f32 %v3497_v21, %v1080_v3 }
 0x863   :  { %v1092_v24 = vmul.f32 %v1091_v20, %v1087_v22 }
 0x865   :  { %v3923_v25 = vadd.f32 %v1096_v23, %v1092_v24  ;;  %v3398_v23 = vld [vmem:[#allocation3 + $0xc0] ss:$12 sps:$4 sm:$0xff]   ;;  %v3400_v24 = vld [vmem:[#allocation3 + $0xc4] ss:$12 sps:$4 sm:$0xff]  }
 0x866   :  { %1646 = vmatprep.subr.bf16.mxu1 %v3400_v24 }
 0x867   :  { %v1098_v27 = vpack.c.bf16 %v3923_v25, %v3923_v25 }
 0x869   :  { %1240 = vmatmul.mubr.bf16.vlgmr.msra.gmra.mrb[20].mxu1 %v1098_v27  ;;  %v3401_v27 = vld [vmem:[#allocation3 + $0xc8] ss:$12 sps:$4 sm:$0xff]  }
 0x86a   :  { %1678 = vmatprep.mubr.bf16.mxu1 %v3636_v26  ;;  %1647 = vmatpush1.bf16.msra.mxu1 %v3398_v23 }
 0x86b   :  { %1648 = vmatprep.subr.bf16.mxu1 %v3404_v28 }
 0x86e   :  { %1649 = vmatpush1.bf16.msra.mxu1 %v3402_v30 }
 0x86f   :  { %1650 = vmatprep.subr.bf16.mxu1 %v3408_v31 }
 0x872   :  { %1651 = vmatpush1.bf16.msra.mxu1 %v3406_v32 }
 0x873   :  { %1652 = vmatprep.subr.bf16.mxu1 %v3412_v40 }
 0x876   :  { %1653 = vmatpush1.bf16.msra.mxu1 %v3410_v41 }
 0x877   :  { %1654 = vmatprep.subr.bf16.mxu1 %v3416_v43 }
 0x87a   :  { %1655 = vmatpush1.bf16.msra.mxu1 %v3414_v44 }
 0x87b   :  { %1656 = vmatprep.subr.bf16.mxu1 %v3420_v47 }
 0x87e   :  { %1657 = vmatpush1.bf16.msra.mxu1 %v3418_v48 }
 0x93c   :  { %v1241_v51 = vpop.f32.mrb[20].mxu1 }
 0x93d   :  { %v1242_v52 = vadd.f32 %v1241_v51, %v1120_v49  ;;  %v1243_v53 = vpop.f32.mrb[21].mxu1  ;;  %v3421_v49 = vld [vmem:[#allocation3 + $0x140] ss:$12 sps:$4 sm:$0xff]   ;;  %v3422_v51 = vld [vmem:[#allocation3 + $0x150] ss:$12 sps:$4 sm:$0xff]  }
 0x93e   :  { %v1244_v54 = vadd.f32 %v1243_v53, %v1124_v50  ;;  %v1245_v55 = vpop.f32.mrb[22].mxu1  ;;  %v3424_v50 = vld [vmem:[#allocation3 + $0x154] ss:$12 sps:$4 sm:$0xff]   ;;  %v3428_v53 = vld [vmem:[#allocation3 + $0x16c] ss:$12 sps:$4 sm:$0xff]  }
 0x93f   :  { %v1248_v56 = vmul.f32 %v1242_v52, %v1242_v52  ;;  %v1246_v57 = vpop.f32.mrb[23].mxu1  ;;  %1658 = vmatprep.subr.bf16.mxu1 %v3424_v50  ;;  %v3429_v55 = vld [vmem:[#allocation3 + $0x170] ss:$12 sps:$4 sm:$0xff]  }
 0x940   :  { %v1249_v58 = vmul.f32 %v1244_v54, %v1244_v54  ;;  %1659 = vmatpush1.bf16.msra.mxu1 %v3422_v51 }
 0x941   :  { %v1250_v59 = vmul.f32 %v1248_v56, %v1242_v52  ;;  %1660 = vmatprep.subr.bf16.mxu1 %v3428_v53 }
 0x942   :  { %v1251_v60 = vmul.f32 %v1249_v58, %v1244_v54 }
 0x943   :  { %v1252_v62 = vmul.f32 0.044715, %v1250_v59  ;;  %v1444_v59 = vld [vmem:[%s4125_s12] sm:$0x3] }
 0x944   :  { %v1253_v63 = vmul.f32 0.044715, %v1251_v60  ;;  %v1459_v60 = vrot.slane %v1444_v59, %v3781_v37 }
 0x945   :  { %v1254_v0 = vadd.f32 %v1252_v62, %v1242_v52 }
 0x946   :  { %v1255_v1 = vadd.f32 %v1253_v63, %v1244_v54 }
 0x947   :  { %v1256_v2 = vmul.f32 0.7978846, %v1254_v0  ;;  %v1464_v0 = vrot.slane %v1444_v59, %v3787_v39 }
 0x948   :  { %v1257_v3 = vmul.f32 0.7978846, %v1255_v1 }
 0x949   :  { %3498 = vtanh.f32 %v1256_v2 }
 0x94a   :  { %3500 = vtanh.f32 %v1257_v3 }
 0x953   :  { %v3499_v5 = vpop.eup %3498 }
 0x954   :  { %v3501_v6 = vpop.eup %3500  ;;  %v1260_v45 = vadd.f32 1.0, %v3499_v5  ;;  %v2922_v5 = vld [vmem:[%s4117_s4 + $0x3] sm:$0x7] }
 0x955   :  { %v1261_v7 = vadd.f32 1.0, %v3501_v6  ;;  %v1506_v6 = vrot.slane %v2922_v5, %v3781_v37 }
 0x956   :  { %v1262_v8 = vmul.f32 0.5, %v1260_v45  ;;  %v1510_v45 = vrot.slane %v2922_v5, %v3787_v39 }
 0x957   :  { %v1263_v10 = vmul.f32 0.5, %v1261_v7 }
 0x958   :  { %v1264_v11 = vmul.f32 %v1262_v8, %v1242_v52  ;;  %v3425_v52 = vld [vmem:[#allocation3 + $0x158] ss:$12 sps:$4 sm:$0xff]  }
 0x959   :  { %v1265_v12 = vmul.f32 %v1263_v10, %v1244_v54  ;;  %v3426_v54 = vld [vmem:[#allocation3 + $0x168] ss:$12 sps:$4 sm:$0xff]  }
 0x95a   :  { %v1266_v14 = vpack.c.bf16 %v1264_v11, %v1264_v11  ;;  %1661 = vmatpush1.bf16.msra.mxu1 %v3426_v54 }
 0x95b   :  { %v1267_v13 = vpack.c.bf16 %v1265_v12, %v1265_v12  ;;  %3239 = vmatprep.subr.mxu1 %v3635_v4 }
 0x95d   :  { %1435 = vmatprep.mubr.bf16.mxu0 %v1267_v13 }
 0x95e   :  { %1436 = vmatmul.mubr.bf16.vlgmr.msra.gmra.mrb[16].mxu0 %v1266_v14 }
 0x95f   :  { %3235 = vmatprep.mubr.msk.bf16.mxu0 %vm3637_vm0, %v3635_v4  ;;  %3220 = vmatpush3.bf16.msra.mxu0 %v3401_v27 }
 0x960   :  { %3221 = vmatprep.subr.bf16.mxu0 %v3635_v4 }
 0x963   :  { %3222 = vmatpush3.bf16.msra.mxu0 %v3405_v29 }
 0x964   :  { %3223 = vmatprep.subr.bf16.mxu0 %v3635_v4 }
 0x967   :  { %3224 = vmatpush3.bf16.msra.mxu0 %v3409_v38 }
 0x968   :  { %3225 = vmatprep.subr.bf16.mxu0 %v3635_v4 }
 0x96b   :  { %3226 = vmatpush3.bf16.msra.mxu0 %v3413_v42 }
 0x96c   :  { %3227 = vmatprep.subr.bf16.mxu0 %v3635_v4 }
 0x96f   :  { %3228 = vmatpush3.bf16.msra.mxu0 %v3417_v46 }
 0x970   :  { %3229 = vmatprep.subr.bf16.mxu0 %v3635_v4 }
 0x973   :  { %3230 = vmatpush3.bf16.msra.mxu0 %v3421_v49 }
 0x974   :  { %3231 = vmatprep.subr.bf16.mxu0 %v3635_v4 }
 0x977   :  { %3232 = vmatpush3.bf16.msra.mxu0 %v3425_v52 }
 0x978   :  { %3233 = vmatprep.subr.bf16.mxu0 %v3635_v4 }
 0x97b   :  { %3234 = vmatpush3.bf16.msra.mxu0 %v3429_v55 }
 0x97c   :  { %3283 = vmatprep.subr.bf16.mxu0 %v3635_v4 }
 0xa31   :  { %v3073_v15 = vpop.f32.mrb[16].mxu0 }
 0xa32   :  { %v3074_v17 = vpop.f32.mrb[17].mxu0 }
 0xa33   :  { %v3075_v18 = vadd.f32 %v3074_v17, %v3073_v15  ;;  %v3076_v19 = vpop.f32.mrb[18].mxu0 }
 0xa34   :  { %v3077_v20 = vpop.f32.mrb[19].mxu0  ;;  %v1514_v19 = vrot.slane %v2922_v5, %v165_v61 }
 0xa35   :  { %v1438_v21 = vadd.f32 %v3075_v18, %v2905_v16 }
 0xa37   :  { %v1443_v22 = vadd.f32 %v1438_v21, %v3923_v25 }
 0xa39   :  { %1445 = vadd.xlane.f32.xlu0 %v1443_v22 }
 0xac6   :  { %v1446_v25 = vpop.xlane.xlu0 %1445 }
 0xac7   :  { %v1447_v33 = vmul.f32 0.0078125, %v1446_v25 }
 0xac9   :  { %v1448_v34 = vsub.f32 %v1443_v22, %v1447_v33 }
 0xacb   :  { %v1449_v35 = vmul.f32 %v1448_v34, %v1448_v34 }
 0xacd   :  { %1450 = vadd.xlane.f32.xlu1 %v1449_v35 }
 0xb5a   :  { %v1451_v56 = vpop.xlane.xlu1 %1450 }
 0xb5b   :  { %v1452_v57 = vmul.f32 0.0078125, %v1451_v56 }
 0xb5d   :  { %v1453_v58 = vadd.f32 1e-12, %v1452_v57 }
 0xb5f   :  { %3502 = vrsqrt.f32 %v1453_v58 }
 0xb69   :  { %v3503_v62 = vpop.eup %3502 }
 0xb6a   :  { %v1455_v63 = vmul.f32 %v3503_v62, %v1448_v34 }
 0xb6c   :  { %v1460_v1 = vmul.f32 %v1459_v60, %v1455_v63 }
 0xb6e   :  { %v3954_v2 = vadd.f32 %v1464_v0, %v1460_v1 }
 0xb70   :  { %v1466_v3 = vpack.c.bf16 %v3954_v2, %v3954_v2 }
 0xb72   :  { %1679 = vmatmul.mubr.bf16.vlgmr.msra.gmra.mrb[24].mxu1 %v1466_v3  ;;  %3236 = vmatmul.mubr.bf16.vlgmr.msra.gmra.mrb[20].mxu0 %v1466_v3 }
 0xb73   :  { %3241 = vmatprep.mubr.msk.f32.mxu1 %vm3637_vm0, %v3635_v4  ;;  %3299 = vmatprep.mubr.msk.bf16.mxu0 %vm3637_vm0, %v3635_v4 }
 0xc45   :  { %v1680_v7 = vpop.f32.mrb[24].mxu1  ;;  %v1721_v8 = vpop.f32.mrb[20].mxu0 }
 0xc46   :  { %v1681_v10 = vadd.f32 %v1680_v7, %v1506_v6  ;;  %v1682_v11 = vpop.f32.mrb[25].mxu1  ;;  %v3237_v12 = vpop.f32.mrb[21].mxu0  ;;  %v1722_v22 = vadd.f32 %v1721_v8, %v1514_v19 }
 0xc47   :  { %v1683_v13 = vadd.f32 %v1682_v11, %v1510_v45  ;;  %v1684_v14 = vpop.f32.mrb[26].mxu1  ;;  %v1724_v15 = vpop.f32.mrb[22].mxu0 }
 0xc48   :  { %v1685_v16 = vpop.f32.mrb[27].mxu1  ;;  %v3238_v17 = vpop.f32.mrb[23].mxu0  ;;  %1803 = vrot.lane.b32.xlu1 %v1681_v10, %s3638_s29  ;;  %v3987_v36 = vpack.c.bf16 %v1722_v22, %v1722_v22 }
 0xc49   :  { %1805 = vrot.lane.b32.xlu0 %v1683_v13, %s3638_s29  ;;  %3240 = vmatpush3.xpose.msk.msra.mxu1 %vm379_vm1, %v1683_v13 }
 0xc4a   :  { %3244 = vmatprep.subr.mxu1 %v3635_v4  ;;  %v2095_v27 = vsel %vm754_vm2, %v3987_v36, 0 }
 0xc4c   :  { %1883 = vrot.lane.b32.xlu1 %v1683_v13, %s3633_s3  ;;  %3242 = vmatmul.mubr.msk.f32.vlgmr.msra.gmra.mrb[28].mxu1 %vm379_vm1, %v1681_v10 }
 0xc4d   :  { %1881 = vrot.lane.b32.xlu0 %v1681_v10, %s3633_s3  ;;  %3246 = vmatprep.mubr.msk.f32.mxu1 %vm3637_vm0, %v3635_v4 }
 0xc50   :  { %1961 = vrot.lane.b32.xlu1 %v1683_v13, %s3639_s30 }
 0xc51   :  { %1959 = vrot.lane.b32.xlu0 %v1681_v10, %s3639_s30 }
 0xcba   :  { %v1804_v18 = vpop.permute.xlu1 %1803 }
 0xcbb   :  { %v1806_v20 = vpop.permute.xlu0 %1805 }
 0xcbc   :  { %3245 = vmatpush3.xpose.msk.msra.mxu1 %vm379_vm1, %v1806_v20 }
 0xcbd   :  { %3249 = vmatprep.subr.mxu1 %v3635_v4 }
 0xcbe   :  { %v1884_v21 = vpop.permute.xlu1 %1883 }
 0xcbf   :  { %3247 = vmatmul.mubr.msk.f32.vlgmr.msra.gmra.mrb[30].mxu1 %vm379_vm1, %v1804_v18  ;;  %v1882_v23 = vpop.permute.xlu0 %1881 }
 0xcc0   :  { %3250 = vmatpush3.xpose.msk.msra.mxu1 %vm379_vm1, %v1884_v21  ;;  %3251 = vmatprep.mubr.msk.f32.mxu1 %vm3637_vm0, %v3635_v4 }
 0xcc1   :  { %3254 = vmatprep.subr.mxu1 %v3635_v4 }
 0xcc2   :  { %v1962_v24 = vpop.permute.xlu1 %1961 }
 0xcc3   :  { %3252 = vmatmul.mubr.msk.f32.vlgmr.msra.gmra.mrb[32].mxu1 %vm379_vm1, %v1882_v23  ;;  %v1960_v61 = vpop.permute.xlu0 %1959 }
 0xcc4   :  { %3255 = vmatpush3.xpose.msk.msra.mxu1 %vm379_vm1, %v1962_v24  ;;  %3256 = vmatprep.mubr.msk.f32.mxu1 %vm3637_vm0, %v3635_v4 }
 0xcc5   :  { %3259 = vmatprep.subr.bf16.mxu1 %v3635_v4 }
 0xcc7   :  { %3257 = vmatmul.mubr.msk.f32.vlgmr.msra.gmra.mrb[34].mxu1 %vm379_vm1, %v1960_v61 }
 0xcc8   :  { %3260 = vmatpush3.bf16.msra.mxu1 %v2095_v27  ;;  %3261 = vmatprep.mubr.msk.bf16.mxu1 %vm3637_vm0, %v3635_v4 }
 0xcc9   :  { %3265 = vmatprep.subr.bf16.mxu1 %v3635_v4 }
 0xd1f   :  { %v1799_v28 = vpop.f32.mrb[28].mxu1 }
 0xd20   :  { %v2037_v29 = vmul.f32 0.17677669, %v1799_v28  ;;  %v3243_v30 = vpop.f32.mrb[29].mxu1 }
 0xd22   :  { %v2041_v31 = vadd.f32 %v3841_v9, %v2037_v29 }
 0xd24   :  { %v2045_v32 = vsel %vm704_vm3, %v2041_v31, -inf }
 0xd25   :  { %2046 = vmax.xlane.f32.xlu1 %v2045_v32 }
 0xd92   :  { %v1877_v25 = vpop.f32.mrb[30].mxu1 }
 0xd93   :  { %v2038_v33 = vmul.f32 0.17677669, %v1877_v25  ;;  %v3248_v34 = vpop.f32.mrb[31].mxu1 }
 0xd94   :  { %v3430_v34 = vld [vmem:[%s4118_s5 + $0x40] sm:$0xff]  }
 0xd95   :  { %v2042_v35 = vadd.f32 %v3841_v9, %v2038_v33  ;;  %3284 = vmatpush3.bf16.msra.mxu0 %v3430_v34 }
 0xd96   :  { %v1955_v38 = vpop.f32.mrb[32].mxu1  ;;  %3285 = vmatprep.subr.bf16.mxu0 %v3635_v4 }
 0xd97   :  { %v2039_v40 = vmul.f32 0.17677669, %v1955_v38  ;;  %v3253_v41 = vpop.f32.mrb[33].mxu1  ;;  %v2048_v42 = vsel %vm704_vm3, %v2042_v35, -inf }
 0xd98   :  { %2049 = vmax.xlane.f32.xlu0 %v2048_v42  ;;  %v3432_v41 = vld [vmem:[%s4118_s5 + $0x50] sm:$0xff]  }
 0xd99   :  { %v2043_v43 = vadd.f32 %v3841_v9, %v2039_v40 }
 0xd9a   :  { %v2033_v44 = vpop.f32.mrb[34].mxu1 }
 0xd9b   :  { %v2040_v46 = vmul.f32 0.17677669, %v2033_v44  ;;  %v3258_v47 = vpop.f32.mrb[35].mxu1  ;;  %v2051_v48 = vsel %vm704_vm3, %v2043_v43, -inf }
 0xd9c   :  { %2052 = vmax.xlane.f32.xlu0 %v2051_v48  ;;  %v3434_v48 = vld [vmem:[%s4118_s5 + $0x60] sm:$0xff]  }
 0xd9d   :  { %v2044_v49 = vadd.f32 %v3841_v9, %v2040_v46 }
 0xd9f   :  { %v2054_v50 = vsel %vm704_vm3, %v2044_v49, -inf }
 0xda0   :  { %2055 = vmax.xlane.f32.xlu1 %v2054_v50  ;;  %v3435_v50 = vld [vmem:[%s4118_s5 + $0x68] sm:$0xff]  }
 0xdb2   :  { %v2047_v51 = vpop.xlane.xlu1 %2046 }
 0xdb3   :  { %v2057_v52 = vsub.f32 %v2041_v31, %v2047_v51  ;;  %v3436_v51 = vld [vmem:[%s4118_s5 + $0x70] sm:$0xff]  }
 0xdb5   :  { %v2061_v53 = vmul.f32 1.442695, %v2057_v52  ;;  %v3437_v52 = vld [vmem:[%s4118_s5 + $0x78] sm:$0xff]  }
 0xdb7   :  { %3504 = vpow2.f32 %v2061_v53 }
 0xdc1   :  { %v3505_v54 = vpop.eup %3504 }
 0xdc2   :  { %v2069_v55 = vsel %vm704_vm3, %v3505_v54, 0.0 }
 0xdc3   :  { %2070 = vadd.xlane.f32.xlu0 %v2069_v55 }
 0xe25   :  { %v2050_v56 = vpop.xlane.xlu0 %2049 }
 0xe26   :  { %v2058_v57 = vsub.f32 %v2042_v35, %v2050_v56  ;;  %v3431_v35 = vld [vmem:[%s4118_s5 + $0x48] sm:$0xff]  }
 0xe27   :  { %3286 = vmatpush3.bf16.msra.mxu0 %v3431_v35 }
 0xe28   :  { %v2063_v58 = vmul.f32 1.442695, %v2058_v57  ;;  %3287 = vmatprep.subr.bf16.mxu0 %v3635_v4 }
 0xe29   :  { %v2053_v59 = vpop.xlane.xlu0 %2052 }
 0xe2a   :  { %3506 = vpow2.f32 %v2063_v58  ;;  %v2059_v60 = vsub.f32 %v2043_v43, %v2053_v59  ;;  %v3433_v43 = vld [vmem:[%s4118_s5 + $0x58] sm:$0xff]  }
 0xe2b   :  { %3288 = vmatpush3.bf16.msra.mxu0 %v3432_v41  ;;  %v3464_v41 = vld [vmem:[#allocation8 + $0xc8] sm:$0xff]  }
 0xe2c   :  { %v2065_v62 = vmul.f32 1.442695, %v2059_v60  ;;  %3289 = vmatprep.subr.bf16.mxu0 %v3635_v4 }
 0xe2d   :  { %v2056_v5 = vpop.xlane.xlu1 %2055 }
 0xe2e   :  { %3508 = vpow2.f32 %v2065_v62  ;;  %v2060_v6 = vsub.f32 %v2044_v49, %v2056_v5 }
 0xe2f   :  { %3290 = vmatpush3.bf16.msra.mxu0 %v3433_v43  ;;  %v3466_v43 = vld [vmem:[#allocation8 + $0xd0] sm:$0xff]  }
 0xe30   :  { %v2067_v45 = vmul.f32 1.442695, %v2060_v6  ;;  %3291 = vmatprep.subr.bf16.mxu0 %v3635_v4 }
 0xe33   :  { %3292 = vmatpush3.bf16.msra.mxu0 %v3434_v48  ;;  %v3470_v48 = vld [vmem:[#allocation8 + $0xe0] sm:$0xff]  }
 0xe34   :  { %v3507_v9 = vpop.eup %3506  ;;  %3293 = vmatprep.subr.bf16.mxu0 %v3635_v4 }
 0xe35   :  { %v2072_v63 = vsel %vm704_vm3, %v3507_v9, 0.0 }
 0xe36   :  { %2073 = vadd.xlane.f32.xlu1 %v2072_v63  ;;  %v2976_v63 = vld [vmem:[%s4119_s6 + $0x1] ss:$0 sm:$0xff] }
 0xe37   :  { %3294 = vmatpush3.bf16.msra.mxu0 %v3435_v50  ;;  %v3472_v50 = vld [vmem:[#allocation8 + $0xe8] sm:$0xff]  }
 0xe38   :  { %v3509_v0 = vpop.eup %3508  ;;  %3295 = vmatprep.subr.bf16.mxu0 %v3635_v4 }
 0xe39   :  { %v2075_v1 = vsel %vm704_vm3, %v3509_v0, 0.0 }
 0xe3a   :  { %2076 = vadd.xlane.f32.xlu0 %v2075_v1 }
 0xe3b   :  { %3296 = vmatpush3.bf16.msra.mxu0 %v3436_v51  ;;  %v3473_v51 = vld [vmem:[#allocation8 + $0xa8] sm:$0xff]  }
 0xe3c   :  { %3297 = vmatprep.subr.bf16.mxu0 %v3635_v4 }
 0xe3f   :  { %3298 = vmatpush3.bf16.msra.mxu0 %v3437_v52  ;;  %v3474_v52 = vld [vmem:[#allocation8 + $0xf0] sm:$0xff]  }
 0xe47   :  { %2188 = vrot.lane.b32.xlu1 %v3987_v36, %s3633_s3 }
 0xe50   :  { %2139 = vrot.lane.b32.xlu0 %v3987_v36, %s3638_s29  ;;  %v2071_v3 = vpop.xlane.xlu0 %2070 }
 0xe51   :  { %3510 = vrcp.f32 %v2071_v3 }
 0xe52   :  { %3512 = vpow2.f32 %v2067_v45 }
 0xe5b   :  { %v3511_v7 = vpop.eup %3510 }
 0xe5c   :  { %v2085_v8 = vmul.f32 %v3511_v7, %v3505_v54  ;;  %v3513_v11 = vpop.eup %3512  ;;  %v3438_v7 = vld [vmem:[#allocation6 + $0x80] ss:$8 sps:$4 sm:$0xff]  }
 0xe5d   :  { %v2078_v12 = vsel %vm704_vm3, %v3513_v11, 0.0 }
 0xe5e   :  { %v2089_v10 = vpack.c.bf16 %v2085_v8, %v2085_v8  ;;  %v3440_v8 = vld [vmem:[#allocation6 + $0x84] ss:$8 sps:$4 sm:$0xff]  }
 0xe60   :  { %3262 = vmatmul.mubr.msk.bf16.vlgmr.msra.gmra.mrb[36].mxu1 %vm704_vm3, %v2089_v10  ;;  %v3443_v10 = vld [vmem:[#allocation6 + $0x94] ss:$8 sps:$4 sm:$0xff]  }
 0xe61   :  { %3267 = vmatprep.mubr.msk.bf16.mxu1 %vm3637_vm0, %v3635_v4 }
 0xe6b   :  { %2079 = vadd.xlane.f32.xlu1 %v2078_v12  ;;  %v3446_v12 = vld [vmem:[#allocation6 + $0xa4] ss:$8 sps:$4 sm:$0xff]  }
 0xe7c   :  { %2237 = vrot.lane.b32.xlu1 %v3987_v36, %s3639_s30 }
 0xec3   :  { %v2074_v13 = vpop.xlane.xlu1 %2073 }
 0xec4   :  { %3514 = vrcp.f32 %v2074_v13  ;;  %v3444_v13 = vld [vmem:[#allocation6 + $0xa0] ss:$8 sps:$4 sm:$0xff]  }
 0xec7   :  { %v2077_v14 = vpop.xlane.xlu0 %2076  ;;  %v2189_v19 = vpop.permute.xlu1 %2188 }
 0xec8   :  { %3516 = vrcp.f32 %v2077_v14  ;;  %v2194_v22 = vsel %vm754_vm2, %v2189_v19, 0  ;;  %v3452_v19 = vld [vmem:[#allocation6 + $0xc4] ss:$8 sps:$4 sm:$0xff]  }
 0xecb   :  { %v2140_v15 = vpop.permute.xlu0 %2139 }
 0xecc   :  { %v2145_v16 = vsel %vm754_vm2, %v2140_v15, 0 }
 0xecd   :  { %3266 = vmatpush3.bf16.msra.mxu1 %v2145_v16 }
 0xece   :  { %v3515_v17 = vpop.eup %3514  ;;  %3271 = vmatprep.subr.bf16.mxu1 %v3635_v4 }
 0xecf   :  { %v2086_v18 = vmul.f32 %v3515_v17, %v3507_v9 }
 0xed1   :  { %v2137_v20 = vpack.c.bf16 %v2086_v18, %v2086_v18  ;;  %v3449_v18 = vld [vmem:[#allocation6 + $0xb4] ss:$8 sps:$4 sm:$0xff]  }
 0xed2   :  { %v3517_v21 = vpop.eup %3516 }
 0xed3   :  { %3268 = vmatmul.mubr.msk.bf16.vlgmr.msra.gmra.mrb[40].mxu1 %vm704_vm3, %v2137_v20  ;;  %v2087_v23 = vmul.f32 %v3517_v21, %v3509_v0  ;;  %v3450_v20 = vld [vmem:[#allocation6 + $0xc0] ss:$8 sps:$4 sm:$0xff]   ;;  %v3455_v21 = vld [vmem:[#allocation6 + $0xd4] ss:$8 sps:$4 sm:$0xff]  }
 0xed4   :  { %3272 = vmatpush3.bf16.msra.mxu1 %v2194_v22  ;;  %3273 = vmatprep.mubr.msk.bf16.mxu1 %vm3637_vm0, %v3635_v4  ;;  %v3453_v22 = vld [vmem:[#allocation6 + $0xd0] ss:$8 sps:$4 sm:$0xff]  }
 0xed5   :  { %3277 = vmatprep.subr.bf16.mxu1 %v3635_v4  ;;  %v2187_v24 = vpack.c.bf16 %v2087_v23, %v2087_v23  ;;  %v3458_v23 = vld [vmem:[#allocation6 + $0xe4] ss:$8 sps:$4 sm:$0xff]  }
 0xedb   :  { %3274 = vmatmul.mubr.msk.bf16.vlgmr.msra.gmra.mrb[44].mxu1 %vm704_vm3, %v2187_v24  ;;  %v3456_v24 = vld [vmem:[#allocation6 + $0xe0] ss:$8 sps:$4 sm:$0xff]  }
 0xedc   :  { %3279 = vmatprep.mubr.msk.bf16.mxu1 %vm3637_vm0, %v3635_v4 }
 0xef8   :  { %v2080_v36 = vpop.xlane.xlu1 %2079 }
 0xef9   :  { %3518 = vrcp.f32 %v2080_v36  ;;  %v3461_v36 = vld [vmem:[#allocation6 + $0xf4] ss:$8 sps:$4 sm:$0xff]  }
 0xefc   :  { %v2238_v61 = vpop.permute.xlu1 %2237 }
 0xefd   :  { %v2243_v27 = vsel %vm754_vm2, %v2238_v61, 0  ;;  %v3459_v61 = vld [vmem:[#allocation6 + $0xf0] ss:$8 sps:$4 sm:$0xff]  }
 0xefe   :  { %3278 = vmatpush3.bf16.msra.mxu1 %v2243_v27 }
 0xeff   :  { %2549 = vmatprep.subr.bf16.mxu1 %v3440_v8 }
 0xf03   :  { %v3519_v28 = vpop.eup %3518 }
 0xf04   :  { %v2088_v29 = vmul.f32 %v3519_v28, %v3513_v11  ;;  %v3441_v11 = vld [vmem:[#allocation6 + $0x90] ss:$8 sps:$4 sm:$0xff]  }
 0xf06   :  { %v2236_v30 = vpack.c.bf16 %v2088_v29, %v2088_v29 }
 0xf08   :  { %3280 = vmatmul.mubr.msk.bf16.vlgmr.msra.gmra.mrb[48].mxu1 %vm704_vm3, %v2236_v30  ;;  %v2985_v30 = vld [vmem:[%s4120_s7 + $0x2] sm:$0x3] }
 0xf09   :  { %2581 = vmatprep.mubr.bf16.mxu1 %v3636_v26  ;;  %2550 = vmatpush1.bf16.msra.mxu1 %v3438_v7 }
 0xf0a   :  { %2551 = vmatprep.subr.bf16.mxu1 %v3443_v10 }
 0xf0d   :  { %2552 = vmatpush1.bf16.msra.mxu1 %v3441_v11 }
 0xf0e   :  { %2553 = vmatprep.subr.bf16.mxu1 %v3446_v12 }
 0xf11   :  { %2554 = vmatpush1.bf16.msra.mxu1 %v3444_v13 }
 0xf12   :  { %2555 = vmatprep.subr.bf16.mxu1 %v3449_v18 }
 0xf33   :  { %v2131_v31 = vpop.f32.mrb[36].mxu1 }
 0xf34   :  { %v3263_v32 = vpop.f32.mrb[37].mxu1 }
 0xf35   :  { %v2134_v25 = vpop.f32.mrb[38].mxu1 }
 0xf36   :  { %v3264_v33 = vpop.f32.mrb[39].mxu1 }
 0xf37   :  { %v2436_v33 = vrot.slane %v2985_v30, %v3787_v39 }
 0xfa6   :  { %v2181_v38 = vpop.f32.mrb[40].mxu1 }
 0xfa7   :  { %2286 = vrot.lane.b32.xlu0 %v2181_v38, %s3639_s30  ;;  %v3269_v40 = vpop.f32.mrb[41].mxu1 }
 0xfa8   :  { %v2184_v26 = vpop.f32.mrb[42].mxu1  ;;  %v3462_v40 = vld [vmem:[#allocation8 + $0xc0] sm:$0xff]  }
 0xfa9   :  { %v3270_v42 = vpop.f32.mrb[43].mxu1  ;;  %v3463_v26 = vld [vmem:[#allocation8 + $0x80] sm:$0xff]   ;;  %3113 = vmatprep.subr.bf16.mxu0 %v3462_v40 }
 0xfaa   :  { %v3465_v42 = vld [vmem:[#allocation8 + $0x88] sm:$0xff]  }
 0xfae   :  { %v2230_v44 = vpop.f32.mrb[44].mxu1 }
 0xfaf   :  { %2290 = vrot.lane.b32.xlu1 %v2230_v44, %s3633_s3  ;;  %v3275_v46 = vpop.f32.mrb[45].mxu1  ;;  %v3467_v44 = vld [vmem:[#allocation8 + $0x90] sm:$0xff]  }
 0xfb0   :  { %v2233_v47 = vpop.f32.mrb[46].mxu1  ;;  %v3468_v46 = vld [vmem:[#allocation8 + $0xd8] sm:$0xff]  }
 0xfb1   :  { %v3276_v49 = vpop.f32.mrb[47].mxu1  ;;  %v3469_v47 = vld [vmem:[#allocation8 + $0x98] sm:$0xff]  }
 0xfb2   :  { %v3471_v49 = vld [vmem:[#allocation8 + $0xa0] sm:$0xff]  }
 0xfdb   :  { %v2279_v53 = vpop.f32.mrb[48].mxu1 }
 0xfdc   :  { %2294 = vrot.lane.b32.xlu0 %v2279_v53, %s3638_s29  ;;  %v3281_v54 = vpop.f32.mrb[49].mxu1  ;;  %v3475_v53 = vld [vmem:[#allocation8 + $0xb0] sm:$0xff]  }
 0xfdd   :  { %v2282_v55 = vpop.f32.mrb[50].mxu1  ;;  %v3476_v54 = vld [vmem:[#allocation8 + $0xf8] sm:$0xff]  }
 0xfde   :  { %v3282_v56 = vpop.f32.mrb[51].mxu1  ;;  %v3477_v55 = vld [vmem:[#allocation8 + $0xb8] sm:$0xff]  }
 0xfdf   :  { %v2986_v56 = vld [vmem:[%s4122_s9 + $0x2] sm:$0x3] }
0x1019   :  { %v2287_v57 = vpop.permute.xlu0 %2286 }
0x101a   :  { %v2297_v59 = vsel %vm379_vm1, %v2131_v31, %v2287_v57  ;;  %v2431_v31 = vrot.slane %v2985_v30, %v3781_v37  ;;  %v2462_v57 = vrot.slane %v2986_v56, %v3781_v37 }
0x1021   :  { %v2291_v58 = vpop.permute.xlu1 %2290 }
0x1022   :  { %v2298_v60 = vsel %vm959_vm4, %v2297_v59, %v2291_v58  ;;  %v2466_v58 = vrot.slane %v2986_v56, %v3787_v39 }
0x104e   :  { %v2295_v62 = vpop.permute.xlu0 %2294 }
0x104f   :  { %v2299_v4 = vsel %vm961_vm5, %v2298_v60, %v2295_v62 }
0x1050   :  { %v2300_v9 = vpack.c.bf16 %v2299_v4, %v2299_v4 }
0x1052   :  { %3300 = vmatmul.mubr.bf16.vlgmr.msra.gmra.mrb[24].mxu0 %v2300_v9 }
0x1053   :  { %3114 = vmatpush3.bf16.msra.mxu0 %v3463_v26 }
0x1054   :  { %3115 = vmatprep.subr.bf16.mxu0 %v3464_v41 }
0x1057   :  { %3116 = vmatpush3.bf16.msra.mxu0 %v3465_v42 }
0x1058   :  { %3117 = vmatprep.subr.bf16.mxu0 %v3466_v43  ;;  %v2811_v43 = vld [vmem:[%s4126_s13] sm:$0x1] }
0x105b   :  { %3118 = vmatpush3.bf16.msra.mxu0 %v3467_v44 }
0x105c   :  { %3119 = vmatprep.subr.bf16.mxu0 %v3468_v46 }
0x105f   :  { %3120 = vmatpush3.bf16.msra.mxu0 %v3469_v47 }
0x1060   :  { %3121 = vmatprep.subr.bf16.mxu0 %v3470_v48  ;;  %v2817_v48 = vld [vmem:[#allocation2] sm:$0x1] }
0x1063   :  { %3122 = vmatpush3.bf16.msra.mxu0 %v3471_v49 }
0x1064   :  { %3123 = vmatprep.subr.bf16.mxu0 %v3472_v50 }
0x1067   :  { %3124 = vmatpush3.bf16.msra.mxu0 %v3473_v51 }
0x1068   :  { %3125 = vmatprep.subr.bf16.mxu0 %v3474_v52 }
0x106b   :  { %3126 = vmatpush3.bf16.msra.mxu0 %v3475_v53 }
0x106c   :  { %3127 = vmatprep.subr.bf16.mxu0 %v3476_v54 }
0x106f   :  { %3128 = vmatpush3.bf16.msra.mxu0 %v3477_v55 }
0x1125   :  { %v2408_v0 = vpop.f32.mrb[24].mxu0 }
0x1126   :  { %v2409_v1 = vadd.f32 %v2976_v63, %v2408_v0  ;;  %v3301_v3 = vpop.f32.mrb[25].mxu0 }
0x1127   :  { %v2411_v5 = vpop.f32.mrb[26].mxu0 }
0x1128   :  { %v3302_v6 = vpop.f32.mrb[27].mxu0  ;;  %v2414_v45 = vadd.f32 %v2409_v1, %v3954_v2  ;;  %v3447_v2 = vld [vmem:[#allocation6 + $0xb0] ss:$8 sps:$4 sm:$0xff]  }
0x1129   :  { %2556 = vmatpush1.bf16.msra.mxu1 %v3447_v2 }
0x112a   :  { %2417 = vadd.xlane.f32.xlu1 %v2414_v45  ;;  %2557 = vmatprep.subr.bf16.mxu1 %v3452_v19 }
0x112d   :  { %2558 = vmatpush1.bf16.msra.mxu1 %v3450_v20 }
0x112e   :  { %2559 = vmatprep.subr.bf16.mxu1 %v3455_v21 }
0x1131   :  { %2560 = vmatpush1.bf16.msra.mxu1 %v3453_v22  ;;  %v3004_v22 = vld [vmem:[%s4124_s11 + $0x1] ss:$0 sm:$0xff] }
0x1132   :  { %2561 = vmatprep.subr.bf16.mxu1 %v3458_v23 }
0x1135   :  { %2562 = vmatpush1.bf16.msra.mxu1 %v3456_v24 }
0x1136   :  { %2563 = vmatprep.subr.bf16.mxu1 %v3461_v36 }
0x1139   :  { %2564 = vmatpush1.bf16.msra.mxu1 %v3459_v61 }
0x11b7   :  { %v2418_v14 = vpop.xlane.xlu1 %2417 }
0x11b8   :  { %v2419_v15 = vmul.f32 0.0078125, %v2418_v14 }
0x11ba   :  { %v2420_v16 = vsub.f32 %v2414_v45, %v2419_v15 }
0x11bc   :  { %v2421_v17 = vmul.f32 %v2420_v16, %v2420_v16 }
0x11be   :  { %2422 = vadd.xlane.f32.xlu0 %v2421_v17 }
0x124b   :  { %v2423_v27 = vpop.xlane.xlu0 %2422 }
0x124c   :  { %v2424_v28 = vmul.f32 0.0078125, %v2423_v27 }
0x124e   :  { %v2425_v29 = vadd.f32 1e-12, %v2424_v28 }
0x1250   :  { %3520 = vrsqrt.f32 %v2425_v29 }
0x125a   :  { %v3521_v32 = vpop.eup %3520 }
0x125b   :  { %v2427_v25 = vmul.f32 %v3521_v32, %v2420_v16 }
0x125d   :  { %v2432_v34 = vmul.f32 %v2431_v31, %v2427_v25 }
0x125f   :  { %v4080_v35 = vadd.f32 %v2436_v33, %v2432_v34 }
0x1261   :  { %v2438_v38 = vpack.c.bf16 %v4080_v35, %v4080_v35 }
0x1263   :  { %2582 = vmatmul.mubr.bf16.vlgmr.msra.gmra.mrb[52].mxu1 %v2438_v38  ;;  %v3021_v38 = vld [vmem:[%s4125_s12 + $0x2] sm:$0x3]  ;;  %s3640_s12 = smov [#allocation9]  }
0x1264   :  { %v2804_v40 = vrot.slane %v3021_v38, %v3781_v37  ;;  %s2833_s4 = sshll.u32 %s3640_s12, 4  ;;  %s2834_s4 = int_to_ptr.vmem [resolvable:$true] %s2833_s4 }
0x1265   :  { %s3598_s13 = scalar_lea.vmem %s2834_s4, 16  ;;  %s3602_s27 = scalar_lea.vmem %s2834_s4, 32 }
0x1266   :  { %p3599_p10 = scmp.ne.s32.totalorder %s2834_s4, %s3598_s13  ;;  %p3603_p11 = scmp.lt.s32.totalorder %s2834_s4, %s2834_s4 }
0x1267   :  { %p3604_p12 = scmp.lt.s32.totalorder %s3602_s27, %s3598_s13 }
0x1269   :  { %p3605_p13 = por %p3604_p12, %p3603_p11 }
0x126b   :  { %p3606_p0 = pnand %p3605_p13, %p3599_p10 }
0x1336   :  { %v2583_v59 = vpop.f32.mrb[52].mxu1 }
0x1337   :  { %v2584_v60 = vadd.f32 %v2583_v59, %v2462_v57  ;;  %v2585_v62 = vpop.f32.mrb[53].mxu1 }
0x1338   :  { %v2586_v4 = vadd.f32 %v2585_v62, %v2466_v58  ;;  %v2587_v9 = vpop.f32.mrb[54].mxu1 }
0x1339   :  { %v2590_v63 = vmul.f32 %v2584_v60, %v2584_v60  ;;  %v2588_v0 = vpop.f32.mrb[55].mxu1 }
0x133a   :  { %v2591_v1 = vmul.f32 %v2586_v4, %v2586_v4 }
0x133b   :  { %v2592_v3 = vmul.f32 %v2590_v63, %v2584_v60 }
0x133c   :  { %v2593_v5 = vmul.f32 %v2591_v1, %v2586_v4 }
0x133d   :  { %v2594_v6 = vmul.f32 0.044715, %v2592_v3 }
0x133e   :  { %v2595_v45 = vmul.f32 0.044715, %v2593_v5 }
0x133f   :  { %v2596_v7 = vadd.f32 %v2594_v6, %v2584_v60 }
0x1340   :  { %v2597_v8 = vadd.f32 %v2595_v45, %v2586_v4 }
0x1341   :  { %v2598_v10 = vmul.f32 0.7978846, %v2596_v7 }
0x1342   :  { %v2599_v11 = vmul.f32 0.7978846, %v2597_v8 }
0x1343   :  { %3522 = vtanh.f32 %v2598_v10 }
0x1344   :  { %3524 = vtanh.f32 %v2599_v11 }
0x134d   :  { %v3523_v12 = vpop.eup %3522 }
0x134e   :  { %v3525_v13 = vpop.eup %3524  ;;  %v2602_v14 = vadd.f32 1.0, %v3523_v12 }
0x134f   :  { %v2603_v15 = vadd.f32 1.0, %v3525_v13 }
0x1350   :  { %v2604_v16 = vmul.f32 0.5, %v2602_v14 }
0x1351   :  { %v2605_v17 = vmul.f32 0.5, %v2603_v15 }
0x1352   :  { %v2606_v18 = vmul.f32 %v2604_v16, %v2584_v60 }
0x1353   :  { %v2607_v2 = vmul.f32 %v2605_v17, %v2586_v4 }
0x1354   :  { %v2608_v20 = vpack.c.bf16 %v2606_v18, %v2606_v18 }
0x1355   :  { %v2609_v19 = vpack.c.bf16 %v2607_v2, %v2607_v2 }
0x1357   :  { %2779 = vmatprep.mubr.bf16.mxu0 %v2609_v19 }
0x1358   :  { %2780 = vmatmul.mubr.bf16.vlgmr.msra.gmra.mrb[28].mxu0 %v2608_v20 }
0x142b   :  { %v3129_v21 = vpop.f32.mrb[28].mxu0 }
0x142c   :  { %v3130_v23 = vpop.f32.mrb[29].mxu0 }
0x142d   :  { %v3131_v24 = vadd.f32 %v3130_v23, %v3129_v21  ;;  %v3132_v36 = vpop.f32.mrb[30].mxu0 }
0x142e   :  { %v3133_v61 = vpop.f32.mrb[31].mxu0 }
0x142f   :  { %v2782_v27 = vadd.f32 %v3131_v24, %v3004_v22 }
0x1431   :  { %v2787_v28 = vadd.f32 %v2782_v27, %v4080_v35  ;;  %v2809_v35 = vrot.slane %v3021_v38, %v3787_v39 }
0x1433   :  { %2790 = vadd.xlane.f32.xlu0 %v2787_v28 }
0x14c0   :  { %v2791_v29 = vpop.xlane.xlu0 %2790 }
0x14c1   :  { %v2792_v30 = vmul.f32 0.0078125, %v2791_v29 }
0x14c3   :  { %v2793_v31 = vsub.f32 %v2787_v28, %v2792_v30 }
0x14c5   :  { %v2794_v32 = vmul.f32 %v2793_v31, %v2793_v31 }
0x14c7   :  { %2795 = vadd.xlane.f32.xlu1 %v2794_v32 }
0x1554   :  { %v2796_v25 = vpop.xlane.xlu1 %2795 }
0x1555   :  { %v2797_v33 = vmul.f32 0.0078125, %v2796_v25 }
0x1557   :  { %v2798_v34 = vadd.f32 1e-12, %v2797_v33 }
0x1559   :  { %3526 = vrsqrt.f32 %v2798_v34 }
0x1563   :  { %v3527_v26 = vpop.eup %3526 }
0x1564   :  { %v2800_v41 = vmul.f32 %v3527_v26, %v2793_v31 }
0x1566   :  { %v2805_v42 = vmul.f32 %v2804_v40, %v2800_v41 }
0x1568   :  { %v2810_v44 = vadd.f32 %v2809_v35, %v2805_v42 }
0x156a   :  { %v2812_v46 = vmul.f32 %v2811_v43, %v2810_v44 }
0x156c   :  { %v2814_v47 = vsel %vm2813_vm6, %v2812_v46, 0.0 }
0x156d   :  { %2815 = vadd.xlane.f32.xlu0 %v2814_v47 }
0x15fa   :  { %v2816_v49 = vpop.xlane.xlu0 %2815 }
0x15fb   :  { %v2818_v50 = vadd.f32 %v2817_v48, %v2816_v49 }
0x15fd   :  { %v3022_v51 = vmul.f32 -1.442695, %v2818_v50 }
0x15ff   :  { %3528 = vpow2.f32 %v3022_v51 }
0x1609   :  { %v3529_v37 = vpop.eup %3528 }
0x160a   :  { %v2822_v52 = vadd.f32 1.0, %v3529_v37 }
0x160c   :  { %3530 = vrcp.f32 %v2822_v52 }
0x1616   :  { %v3531_v39 = vpop.eup %3530 }
0x1617   :  { %2826 = vst.msk [vmem:[#allocation9] sm:$0x1] %vm2825_vm7, %v3531_v39 }
0x1618   :  { %3609 = shalt.err (!%p3606_p0)
}
0x1619   :  { %s3610_s21 = scalar_lea.hbm %s4128_s15, 16 }
0x161a   :  { %p3611_p1 = scmp.ne.s32.totalorder %s4128_s15, %s3610_s21  ;;  %p3614_p2 = scmp.lt.u32.totalorder %s3610_s21, %s4128_s15 }
0x161c   :  { %p3616_p3 = pnand %p3614_p2, %p3611_p1 }
0x161e   :  { %3619 = shalt.err (!%p3616_p3)
}
0x161f   :  { %2836 = dma.vmem_to_hbm [thread:$0]  %s2834_s4, 16, %s4128_s15, [#allocation5]  }
0x1620   :  { %3624 = dma.done.wait [#allocation5], 16  }
0x1621   :  { %3625 = vsyncadd [#allocation5], 4294967280 }
0x1622   :  { %2840 = vsyncpa [#allocation4], 1 }
0x1623   :  { %2841 = vsyncpa [#allocation7], 1 }
0x1624   :  { %2842 = vsyncpa [#allocation5], 1 }

</bundles_post_ra>
